<compile_context>
chip_gen: v5e
topology: v5e:2x2
jax: 0.10.0
libtpu: 0.0.40
codegen_flags: <defaults>
</compile_context>

<pallas_src>
import functools

import jax
import jax.numpy as jnp
from jax.experimental import pallas as pl
from jax.experimental.pallas import tpu as pltpu

K = 7  # Conv kernel size fixed by the module.


def _embedder_kernel(x_ref, w_ref, o_ref, *, oh_out, ow_out):
    # x_ref: (H, W, C_in)        one batch element, NHWC
    # w_ref: (K*K, C_in, C_out)  weights, index [kh*K + kw]
    # o_ref: (OH, OW, C_out)     one batch element, NHWC conv output
    c_out = o_ref.shape[-1]

    @pl.loop(0, oh_out)
    def _(oh):
        acc = jnp.zeros((ow_out, c_out), jnp.float32)
        for kh in range(K):                      # static, unrolled
            row = x_ref[oh + kh]                 # (W, C_in) dynamic leading index
            for kw in range(K):                  # static, unrolled
                acc = acc + jnp.dot(
                    row[kw:kw + ow_out, :],      # (OW, C_in) static slice
                    w_ref[kh * K + kw],          # (C_in, C_out)
                    preferred_element_type=jnp.float32,
                )
        o_ref[oh] = acc.astype(o_ref.dtype)      # dynamic-row store


def embedder_forward(x, w):
    """x: (B, C_in, H, W) f32; w: (C_out, C_in, 7, 7) (PyTorch OIHW).

    Returns (B, C_out*(H-6)*(W-6)) == Flatten(Conv2d(..., k=7, bias=False)(x)).
    """
    b, c_in, h, wd = x.shape
    c_out = w.shape[0]
    assert w.shape == (c_out, c_in, K, K)
    assert h >= K and wd >= K, "spatial dims must be >= kernel size (7)"
    oh, ow = h - K + 1, wd - K + 1

    # Layout plumbing outside the kernel (cheap XLA transposes of small data).
    x_nhwc = jnp.transpose(x, (0, 2, 3, 1))                        # (B, H, W, Ci)
    w_kkio = jnp.transpose(w, (2, 3, 1, 0)).reshape(K * K, c_in, c_out)

    kernel = functools.partial(_embedder_kernel, oh_out=oh, ow_out=ow)
    out_nhwc = pl.pallas_call(
        kernel,
        out_shape=jax.ShapeDtypeStruct((b, oh, ow, c_out), x.dtype),
        grid_spec=pltpu.PrefetchScalarGridSpec(
            num_scalar_prefetch=0,
            grid=(b,),
            in_specs=[
                # Batch dim squeezed -> kernel sees (H, W, C_in); full image per step.
                pl.BlockSpec((None, h, wd, c_in), lambda i: (i, 0, 0, 0)),
                # Weights: constant index_map -> DMA'd once, stays VMEM-resident.
                pl.BlockSpec((K * K, c_in, c_out), lambda i: (0, 0, 0)),
            ],
            out_specs=pl.BlockSpec((None, oh, ow, c_out), lambda i: (i, 0, 0, 0)),
        ),
        compiler_params=pltpu.CompilerParams(
            dimension_semantics=("parallel",),
        ),
    )(x_nhwc, w_kkio)

    # PyTorch Flatten order: (B, C_out, OH, OW) -> (B, C_out*OH*OW).
    return jnp.transpose(out_nhwc, (0, 3, 1, 2)).reshape(b, -1)


if __name__ == "__main__":
    batch, feature_size, out_size = 2, 4, 8
    spatial = 16

    key = jax.random.PRNGKey(0)
    k1, k2 = jax.random.split(key)
    x = jax.random.normal(k1, (batch, feature_size, spatial, spatial), dtype=jnp.float32)
    w = 0.1 * jax.random.normal(k2, (out_size, feature_size, K, K), dtype=jnp.float32)
    # Round inputs to bf16-representable f32 so MXU (bf16 multiply, f32 accumulate)
    # and the f32 XLA reference agree to f32 accumulation-order error only.
    x = x.astype(jnp.bfloat16).astype(jnp.float32)
    w = w.astype(jnp.bfloat16).astype(jnp.float32)

    out = embedder_forward(x, w)
    out = jax.block_until_ready(out)

    # Plain-JAX reference: Conv2d(k=7, stride 1, no padding, no bias) + Flatten.
    ref = jax.lax.conv_general_dilated(
        x, w, window_strides=(1, 1), padding="VALID",
        dimension_numbers=("NCHW", "OIHW", "NCHW"),
    ).reshape(batch, -1)

    oh = ow = spatial - K + 1
    assert out.shape == (batch, out_size * oh * ow)
    assert jnp.allclose(out, ref, atol=1e-4, rtol=1e-4)

    print("KERNEL_OK")
</pallas_src>

<mosaic_0001>
module attributes {stable_mosaic.version = 11 : i64} {
  func.func @_embedder_kernel(%arg0: i32, %arg1: memref<1x16x16x4xf32, #tpu.memory_space<vmem>>, %arg2: memref<49x4x8xf32, #tpu.memory_space<vmem>>, %arg3: memref<1x10x10x8xf32, #tpu.memory_space<vmem>>) attributes {dimension_semantics = [#tpu.dimension_semantics<parallel>], iteration_bounds = array<i64: 2>, scalar_prefetch = 0 : i64, scratch_operands = 0 : i64, tpu.core_type = #tpu.core_type<tc>, window_params = [{transform_indices = @transform_0, window_bounds = array<i64: 1, 16, 16, 4>}, {pipeline_mode = #tpu.pipeline_mode<synchronous>, transform_indices = @transform_1, window_bounds = array<i64: 49, 4, 8>}, {transform_indices = @transform_2, window_bounds = array<i64: 1, 10, 10, 8>}]} {
    %c0_i32 = arith.constant 0 : i32
    %c10_i32 = arith.constant 10 : i32
    %0 = arith.addi %c0_i32, %c10_i32 : i32
    %c1_i32 = arith.constant 1 : i32
    scf.for %arg4 = %c0_i32 to %0 step %c1_i32  : i32 {
      %c1_i32_1 = arith.constant 1 : i32
      %1 = arith.muli %arg4, %c1_i32_1 : i32
      %c0_i32_2 = arith.constant 0 : i32
      %2 = arith.addi %c0_i32_2, %1 : i32
      %cst = arith.constant 0.000000e+00 : f32
      %3 = vector.broadcast %cst : f32 to vector<10x8xf32>
      %c0_i32_3 = arith.constant 0 : i32
      %4 = arith.addi %2, %c0_i32_3 : i32
      %c0 = arith.constant 0 : index
      %5 = arith.index_cast %4 : i32 to index
      %c0_4 = arith.constant 0 : index
      %c0_5 = arith.constant 0 : index
      %6 = vector.load %arg1[%c0, %5, %c0_4, %c0_5] : memref<1x16x16x4xf32, #tpu.memory_space<vmem>>, vector<1x1x16x4xf32>
      %7 = vector.shape_cast %6 : vector<1x1x16x4xf32> to vector<16x4xf32>
      %8 = vector.extract_strided_slice %7 {offsets = [0, 0], sizes = [10, 4], strides = [1, 1]} : vector<16x4xf32> to vector<10x4xf32>
      %c0_6 = arith.constant 0 : index
      %c0_7 = arith.constant 0 : index
      %c0_8 = arith.constant 0 : index
      %9 = vector.load %arg2[%c0_6, %c0_7, %c0_8] : memref<49x4x8xf32, #tpu.memory_space<vmem>>, vector<1x4x8xf32>
      %10 = vector.shape_cast %9 : vector<1x4x8xf32> to vector<4x8xf32>
      %cst_9 = arith.constant dense<0.000000e+00> : vector<10x8xf32>
      %11 = tpu.matmul %8, %10, %cst_9 {dimension_numbers = #tpu.dot_dimension_numbers<[1], [0], [0], [1], [0, 0, 1, 1], [], []>} : vector<10x4xf32>, vector<4x8xf32>, vector<10x8xf32> -> vector<10x8xf32>
      %12 = arith.addf %3, %11 : vector<10x8xf32>
      %13 = vector.extract_strided_slice %7 {offsets = [1, 0], sizes = [10, 4], strides = [1, 1]} : vector<16x4xf32> to vector<10x4xf32>
      %c1 = arith.constant 1 : index
      %c0_10 = arith.constant 0 : index
      %c0_11 = arith.constant 0 : index
      %14 = vector.load %arg2[%c1, %c0_10, %c0_11] : memref<49x4x8xf32, #tpu.memory_space<vmem>>, vector<1x4x8xf32>
      %15 = vector.shape_cast %14 : vector<1x4x8xf32> to vector<4x8xf32>
      %cst_12 = arith.constant dense<0.000000e+00> : vector<10x8xf32>
      %16 = tpu.matmul %13, %15, %cst_12 {dimension_numbers = #tpu.dot_dimension_numbers<[1], [0], [0], [1], [0, 0, 1, 1], [], []>} : vector<10x4xf32>, vector<4x8xf32>, vector<10x8xf32> -> vector<10x8xf32>
      %17 = arith.addf %12, %16 : vector<10x8xf32>
      %18 = vector.extract_strided_slice %7 {offsets = [2, 0], sizes = [10, 4], strides = [1, 1]} : vector<16x4xf32> to vector<10x4xf32>
      %c2 = arith.constant 2 : index
      %c0_13 = arith.constant 0 : index
      %c0_14 = arith.constant 0 : index
      %19 = vector.load %arg2[%c2, %c0_13, %c0_14] : memref<49x4x8xf32, #tpu.memory_space<vmem>>, vector<1x4x8xf32>
      %20 = vector.shape_cast %19 : vector<1x4x8xf32> to vector<4x8xf32>
      %cst_15 = arith.constant dense<0.000000e+00> : vector<10x8xf32>
      %21 = tpu.matmul %18, %20, %cst_15 {dimension_numbers = #tpu.dot_dimension_numbers<[1], [0], [0], [1], [0, 0, 1, 1], [], []>} : vector<10x4xf32>, vector<4x8xf32>, vector<10x8xf32> -> vector<10x8xf32>
      %22 = arith.addf %17, %21 : vector<10x8xf32>
      %23 = vector.extract_strided_slice %7 {offsets = [3, 0], sizes = [10, 4], strides = [1, 1]} : vector<16x4xf32> to vector<10x4xf32>
      %c3 = arith.constant 3 : index
      %c0_16 = arith.constant 0 : index
      %c0_17 = arith.constant 0 : index
      %24 = vector.load %arg2[%c3, %c0_16, %c0_17] : memref<49x4x8xf32, #tpu.memory_space<vmem>>, vector<1x4x8xf32>
      %25 = vector.shape_cast %24 : vector<1x4x8xf32> to vector<4x8xf32>
      %cst_18 = arith.constant dense<0.000000e+00> : vector<10x8xf32>
      %26 = tpu.matmul %23, %25, %cst_18 {dimension_numbers = #tpu.dot_dimension_numbers<[1], [0], [0], [1], [0, 0, 1, 1], [], []>} : vector<10x4xf32>, vector<4x8xf32>, vector<10x8xf32> -> vector<10x8xf32>
      %27 = arith.addf %22, %26 : vector<10x8xf32>
      %28 = vector.extract_strided_slice %7 {offsets = [4, 0], sizes = [10, 4], strides = [1, 1]} : vector<16x4xf32> to vector<10x4xf32>
      %c4 = arith.constant 4 : index
      %c0_19 = arith.constant 0 : index
      %c0_20 = arith.constant 0 : index
      %29 = vector.load %arg2[%c4, %c0_19, %c0_20] : memref<49x4x8xf32, #tpu.memory_space<vmem>>, vector<1x4x8xf32>
      %30 = vector.shape_cast %29 : vector<1x4x8xf32> to vector<4x8xf32>
      %cst_21 = arith.constant dense<0.000000e+00> : vector<10x8xf32>
      %31 = tpu.matmul %28, %30, %cst_21 {dimension_numbers = #tpu.dot_dimension_numbers<[1], [0], [0], [1], [0, 0, 1, 1], [], []>} : vector<10x4xf32>, vector<4x8xf32>, vector<10x8xf32> -> vector<10x8xf32>
      %32 = arith.addf %27, %31 : vector<10x8xf32>
      %33 = vector.extract_strided_slice %7 {offsets = [5, 0], sizes = [10, 4], strides = [1, 1]} : vector<16x4xf32> to vector<10x4xf32>
      %c5 = arith.constant 5 : index
      %c0_22 = arith.constant 0 : index
      %c0_23 = arith.constant 0 : index
      %34 = vector.load %arg2[%c5, %c0_22, %c0_23] : memref<49x4x8xf32, #tpu.memory_space<vmem>>, vector<1x4x8xf32>
      %35 = vector.shape_cast %34 : vector<1x4x8xf32> to vector<4x8xf32>
      %cst_24 = arith.constant dense<0.000000e+00> : vector<10x8xf32>
      %36 = tpu.matmul %33, %35, %cst_24 {dimension_numbers = #tpu.dot_dimension_numbers<[1], [0], [0], [1], [0, 0, 1, 1], [], []>} : vector<10x4xf32>, vector<4x8xf32>, vector<10x8xf32> -> vector<10x8xf32>
      %37 = arith.addf %32, %36 : vector<10x8xf32>
      %38 = vector.extract_strided_slice %7 {offsets = [6, 0], sizes = [10, 4], strides = [1, 1]} : vector<16x4xf32> to vector<10x4xf32>
      %c6 = arith.constant 6 : index
      %c0_25 = arith.constant 0 : index
      %c0_26 = arith.constant 0 : index
      %39 = vector.load %arg2[%c6, %c0_25, %c0_26] : memref<49x4x8xf32, #tpu.memory_space<vmem>>, vector<1x4x8xf32>
      %40 = vector.shape_cast %39 : vector<1x4x8xf32> to vector<4x8xf32>
      %cst_27 = arith.constant dense<0.000000e+00> : vector<10x8xf32>
      %41 = tpu.matmul %38, %40, %cst_27 {dimension_numbers = #tpu.dot_dimension_numbers<[1], [0], [0], [1], [0, 0, 1, 1], [], []>} : vector<10x4xf32>, vector<4x8xf32>, vector<10x8xf32> -> vector<10x8xf32>
      %42 = arith.addf %37, %41 : vector<10x8xf32>
      %c1_i32_28 = arith.constant 1 : i32
      %43 = arith.addi %2, %c1_i32_28 : i32
      %c0_29 = arith.constant 0 : index
      %44 = arith.index_cast %43 : i32 to index
      %c0_30 = arith.constant 0 : index
      %c0_31 = arith.constant 0 : index
      %45 = vector.load %arg1[%c0_29, %44, %c0_30, %c0_31] : memref<1x16x16x4xf32, #tpu.memory_space<vmem>>, vector<1x1x16x4xf32>
      %46 = vector.shape_cast %45 : vector<1x1x16x4xf32> to vector<16x4xf32>
      %47 = vector.extract_strided_slice %46 {offsets = [0, 0], sizes = [10, 4], strides = [1, 1]} : vector<16x4xf32> to vector<10x4xf32>
      %c7 = arith.constant 7 : index
      %c0_32 = arith.constant 0 : index
      %c0_33 = arith.constant 0 : index
      %48 = vector.load %arg2[%c7, %c0_32, %c0_33] : memref<49x4x8xf32, #tpu.memory_space<vmem>>, vector<1x4x8xf32>
      %49 = vector.shape_cast %48 : vector<1x4x8xf32> to vector<4x8xf32>
      %cst_34 = arith.constant dense<0.000000e+00> : vector<10x8xf32>
      %50 = tpu.matmul %47, %49, %cst_34 {dimension_numbers = #tpu.dot_dimension_numbers<[1], [0], [0], [1], [0, 0, 1, 1], [], []>} : vector<10x4xf32>, vector<4x8xf32>, vector<10x8xf32> -> vector<10x8xf32>
      %51 = arith.addf %42, %50 : vector<10x8xf32>
      %52 = vector.extract_strided_slice %46 {offsets = [1, 0], sizes = [10, 4], strides = [1, 1]} : vector<16x4xf32> to vector<10x4xf32>
      %c8 = arith.constant 8 : index
      %c0_35 = arith.constant 0 : index
      %c0_36 = arith.constant 0 : index
      %53 = vector.load %arg2[%c8, %c0_35, %c0_36] : memref<49x4x8xf32, #tpu.memory_space<vmem>>, vector<1x4x8xf32>
      %54 = vector.shape_cast %53 : vector<1x4x8xf32> to vector<4x8xf32>
      %cst_37 = arith.constant dense<0.000000e+00> : vector<10x8xf32>
      %55 = tpu.matmul %52, %54, %cst_37 {dimension_numbers = #tpu.dot_dimension_numbers<[1], [0], [0], [1], [0, 0, 1, 1], [], []>} : vector<10x4xf32>, vector<4x8xf32>, vector<10x8xf32> -> vector<10x8xf32>
      %56 = arith.addf %51, %55 : vector<10x8xf32>
      %57 = vector.extract_strided_slice %46 {offsets = [2, 0], sizes = [10, 4], strides = [1, 1]} : vector<16x4xf32> to vector<10x4xf32>
      %c9 = arith.constant 9 : index
      %c0_38 = arith.constant 0 : index
      %c0_39 = arith.constant 0 : index
      %58 = vector.load %arg2[%c9, %c0_38, %c0_39] : memref<49x4x8xf32, #tpu.memory_space<vmem>>, vector<1x4x8xf32>
      %59 = vector.shape_cast %58 : vector<1x4x8xf32> to vector<4x8xf32>
      %cst_40 = arith.constant dense<0.000000e+00> : vector<10x8xf32>
      %60 = tpu.matmul %57, %59, %cst_40 {dimension_numbers = #tpu.dot_dimension_numbers<[1], [0], [0], [1], [0, 0, 1, 1], [], []>} : vector<10x4xf32>, vector<4x8xf32>, vector<10x8xf32> -> vector<10x8xf32>
      %61 = arith.addf %56, %60 : vector<10x8xf32>
      %62 = vector.extract_strided_slice %46 {offsets = [3, 0], sizes = [10, 4], strides = [1, 1]} : vector<16x4xf32> to vector<10x4xf32>
      %c10 = arith.constant 10 : index
      %c0_41 = arith.constant 0 : index
      %c0_42 = arith.constant 0 : index
      %63 = vector.load %arg2[%c10, %c0_41, %c0_42] : memref<49x4x8xf32, #tpu.memory_space<vmem>>, vector<1x4x8xf32>
      %64 = vector.shape_cast %63 : vector<1x4x8xf32> to vector<4x8xf32>
      %cst_43 = arith.constant dense<0.000000e+00> : vector<10x8xf32>
      %65 = tpu.matmul %62, %64, %cst_43 {dimension_numbers = #tpu.dot_dimension_numbers<[1], [0], [0], [1], [0, 0, 1, 1], [], []>} : vector<10x4xf32>, vector<4x8xf32>, vector<10x8xf32> -> vector<10x8xf32>
      %66 = arith.addf %61, %65 : vector<10x8xf32>
      %67 = vector.extract_strided_slice %46 {offsets = [4, 0], sizes = [10, 4], strides = [1, 1]} : vector<16x4xf32> to vector<10x4xf32>
      %c11 = arith.constant 11 : index
      %c0_44 = arith.constant 0 : index
      %c0_45 = arith.constant 0 : index
      %68 = vector.load %arg2[%c11, %c0_44, %c0_45] : memref<49x4x8xf32, #tpu.memory_space<vmem>>, vector<1x4x8xf32>
      %69 = vector.shape_cast %68 : vector<1x4x8xf32> to vector<4x8xf32>
      %cst_46 = arith.constant dense<0.000000e+00> : vector<10x8xf32>
      %70 = tpu.matmul %67, %69, %cst_46 {dimension_numbers = #tpu.dot_dimension_numbers<[1], [0], [0], [1], [0, 0, 1, 1], [], []>} : vector<10x4xf32>, vector<4x8xf32>, vector<10x8xf32> -> vector<10x8xf32>
      %71 = arith.addf %66, %70 : vector<10x8xf32>
      %72 = vector.extract_strided_slice %46 {offsets = [5, 0], sizes = [10, 4], strides = [1, 1]} : vector<16x4xf32> to vector<10x4xf32>
      %c12 = arith.constant 12 : index
      %c0_47 = arith.constant 0 : index
      %c0_48 = arith.constant 0 : index
      %73 = vector.load %arg2[%c12, %c0_47, %c0_48] : memref<49x4x8xf32, #tpu.memory_space<vmem>>, vector<1x4x8xf32>
      %74 = vector.shape_cast %73 : vector<1x4x8xf32> to vector<4x8xf32>
      %cst_49 = arith.constant dense<0.000000e+00> : vector<10x8xf32>
      %75 = tpu.matmul %72, %74, %cst_49 {dimension_numbers = #tpu.dot_dimension_numbers<[1], [0], [0], [1], [0, 0, 1, 1], [], []>} : vector<10x4xf32>, vector<4x8xf32>, vector<10x8xf32> -> vector<10x8xf32>
      %76 = arith.addf %71, %75 : vector<10x8xf32>
      %77 = vector.extract_strided_slice %46 {offsets = [6, 0], sizes = [10, 4], strides = [1, 1]} : vector<16x4xf32> to vector<10x4xf32>
      %c13 = arith.constant 13 : index
      %c0_50 = arith.constant 0 : index
      %c0_51 = arith.constant 0 : index
      %78 = vector.load %arg2[%c13, %c0_50, %c0_51] : memref<49x4x8xf32, #tpu.memory_space<vmem>>, vector<1x4x8xf32>
      %79 = vector.shape_cast %78 : vector<1x4x8xf32> to vector<4x8xf32>
      %cst_52 = arith.constant dense<0.000000e+00> : vector<10x8xf32>
      %80 = tpu.matmul %77, %79, %cst_52 {dimension_numbers = #tpu.dot_dimension_numbers<[1], [0], [0], [1], [0, 0, 1, 1], [], []>} : vector<10x4xf32>, vector<4x8xf32>, vector<10x8xf32> -> vector<10x8xf32>
      %81 = arith.addf %76, %80 : vector<10x8xf32>
      %c2_i32 = arith.constant 2 : i32
      %82 = arith.addi %2, %c2_i32 : i32
      %c0_53 = arith.constant 0 : index
      %83 = arith.index_cast %82 : i32 to index
      %c0_54 = arith.constant 0 : index
      %c0_55 = arith.constant 0 : index
      %84 = vector.load %arg1[%c0_53, %83, %c0_54, %c0_55] : memref<1x16x16x4xf32, #tpu.memory_space<vmem>>, vector<1x1x16x4xf32>
      %85 = vector.shape_cast %84 : vector<1x1x16x4xf32> to vector<16x4xf32>
      %86 = vector.extract_strided_slice %85 {offsets = [0, 0], sizes = [10, 4], strides = [1, 1]} : vector<16x4xf32> to vector<10x4xf32>
      %c14 = arith.constant 14 : index
      %c0_56 = arith.constant 0 : index
      %c0_57 = arith.constant 0 : index
      %87 = vector.load %arg2[%c14, %c0_56, %c0_57] : memref<49x4x8xf32, #tpu.memory_space<vmem>>, vector<1x4x8xf32>
      %88 = vector.shape_cast %87 : vector<1x4x8xf32> to vector<4x8xf32>
      %cst_58 = arith.constant dense<0.000000e+00> : vector<10x8xf32>
      %89 = tpu.matmul %86, %88, %cst_58 {dimension_numbers = #tpu.dot_dimension_numbers<[1], [0], [0], [1], [0, 0, 1, 1], [], []>} : vector<10x4xf32>, vector<4x8xf32>, vector<10x8xf32> -> vector<10x8xf32>
      %90 = arith.addf %81, %89 : vector<10x8xf32>
      %91 = vector.extract_strided_slice %85 {offsets = [1, 0], sizes = [10, 4], strides = [1, 1]} : vector<16x4xf32> to vector<10x4xf32>
      %c15 = arith.constant 15 : index
      %c0_59 = arith.constant 0 : index
      %c0_60 = arith.constant 0 : index
      %92 = vector.load %arg2[%c15, %c0_59, %c0_60] : memref<49x4x8xf32, #tpu.memory_space<vmem>>, vector<1x4x8xf32>
      %93 = vector.shape_cast %92 : vector<1x4x8xf32> to vector<4x8xf32>
      %cst_61 = arith.constant dense<0.000000e+00> : vector<10x8xf32>
      %94 = tpu.matmul %91, %93, %cst_61 {dimension_numbers = #tpu.dot_dimension_numbers<[1], [0], [0], [1], [0, 0, 1, 1], [], []>} : vector<10x4xf32>, vector<4x8xf32>, vector<10x8xf32> -> vector<10x8xf32>
      %95 = arith.addf %90, %94 : vector<10x8xf32>
      %96 = vector.extract_strided_slice %85 {offsets = [2, 0], sizes = [10, 4], strides = [1, 1]} : vector<16x4xf32> to vector<10x4xf32>
      %c16 = arith.constant 16 : index
      %c0_62 = arith.constant 0 : index
      %c0_63 = arith.constant 0 : index
      %97 = vector.load %arg2[%c16, %c0_62, %c0_63] : memref<49x4x8xf32, #tpu.memory_space<vmem>>, vector<1x4x8xf32>
      %98 = vector.shape_cast %97 : vector<1x4x8xf32> to vector<4x8xf32>
      %cst_64 = arith.constant dense<0.000000e+00> : vector<10x8xf32>
      %99 = tpu.matmul %96, %98, %cst_64 {dimension_numbers = #tpu.dot_dimension_numbers<[1], [0], [0], [1], [0, 0, 1, 1], [], []>} : vector<10x4xf32>, vector<4x8xf32>, vector<10x8xf32> -> vector<10x8xf32>
      %100 = arith.addf %95, %99 : vector<10x8xf32>
      %101 = vector.extract_strided_slice %85 {offsets = [3, 0], sizes = [10, 4], strides = [1, 1]} : vector<16x4xf32> to vector<10x4xf32>
      %c17 = arith.constant 17 : index
      %c0_65 = arith.constant 0 : index
      %c0_66 = arith.constant 0 : index
      %102 = vector.load %arg2[%c17, %c0_65, %c0_66] : memref<49x4x8xf32, #tpu.memory_space<vmem>>, vector<1x4x8xf32>
      %103 = vector.shape_cast %102 : vector<1x4x8xf32> to vector<4x8xf32>
      %cst_67 = arith.constant dense<0.000000e+00> : vector<10x8xf32>
      %104 = tpu.matmul %101, %103, %cst_67 {dimension_numbers = #tpu.dot_dimension_numbers<[1], [0], [0], [1], [0, 0, 1, 1], [], []>} : vector<10x4xf32>, vector<4x8xf32>, vector<10x8xf32> -> vector<10x8xf32>
      %105 = arith.addf %100, %104 : vector<10x8xf32>
      %106 = vector.extract_strided_slice %85 {offsets = [4, 0], sizes = [10, 4], strides = [1, 1]} : vector<16x4xf32> to vector<10x4xf32>
      %c18 = arith.constant 18 : index
      %c0_68 = arith.constant 0 : index
      %c0_69 = arith.constant 0 : index
      %107 = vector.load %arg2[%c18, %c0_68, %c0_69] : memref<49x4x8xf32, #tpu.memory_space<vmem>>, vector<1x4x8xf32>
      %108 = vector.shape_cast %107 : vector<1x4x8xf32> to vector<4x8xf32>
      %cst_70 = arith.constant dense<0.000000e+00> : vector<10x8xf32>
      %109 = tpu.matmul %106, %108, %cst_70 {dimension_numbers = #tpu.dot_dimension_numbers<[1], [0], [0], [1], [0, 0, 1, 1], [], []>} : vector<10x4xf32>, vector<4x8xf32>, vector<10x8xf32> -> vector<10x8xf32>
      %110 = arith.addf %105, %109 : vector<10x8xf32>
      %111 = vector.extract_strided_slice %85 {offsets = [5, 0], sizes = [10, 4], strides = [1, 1]} : vector<16x4xf32> to vector<10x4xf32>
      %c19 = arith.constant 19 : index
      %c0_71 = arith.constant 0 : index
      %c0_72 = arith.constant 0 : index
      %112 = vector.load %arg2[%c19, %c0_71, %c0_72] : memref<49x4x8xf32, #tpu.memory_space<vmem>>, vector<1x4x8xf32>
      %113 = vector.shape_cast %112 : vector<1x4x8xf32> to vector<4x8xf32>
      %cst_73 = arith.constant dense<0.000000e+00> : vector<10x8xf32>
      %114 = tpu.matmul %111, %113, %cst_73 {dimension_numbers = #tpu.dot_dimension_numbers<[1], [0], [0], [1], [0, 0, 1, 1], [], []>} : vector<10x4xf32>, vector<4x8xf32>, vector<10x8xf32> -> vector<10x8xf32>
      %115 = arith.addf %110, %114 : vector<10x8xf32>
      %116 = vector.extract_strided_slice %85 {offsets = [6, 0], sizes = [10, 4], strides = [1, 1]} : vector<16x4xf32> to vector<10x4xf32>
      %c20 = arith.constant 20 : index
      %c0_74 = arith.constant 0 : index
      %c0_75 = arith.constant 0 : index
      %117 = vector.load %arg2[%c20, %c0_74, %c0_75] : memref<49x4x8xf32, #tpu.memory_space<vmem>>, vector<1x4x8xf32>
      %118 = vector.shape_cast %117 : vector<1x4x8xf32> to vector<4x8xf32>
      %cst_76 = arith.constant dense<0.000000e+00> : vector<10x8xf32>
      %119 = tpu.matmul %116, %118, %cst_76 {dimension_numbers = #tpu.dot_dimension_numbers<[1], [0], [0], [1], [0, 0, 1, 1], [], []>} : vector<10x4xf32>, vector<4x8xf32>, vector<10x8xf32> -> vector<10x8xf32>
      %120 = arith.addf %115, %119 : vector<10x8xf32>
      %c3_i32 = arith.constant 3 : i32
      %121 = arith.addi %2, %c3_i32 : i32
      %c0_77 = arith.constant 0 : index
      %122 = arith.index_cast %121 : i32 to index
      %c0_78 = arith.constant 0 : index
      %c0_79 = arith.constant 0 : index
      %123 = vector.load %arg1[%c0_77, %122, %c0_78, %c0_79] : memref<1x16x16x4xf32, #tpu.memory_space<vmem>>, vector<1x1x16x4xf32>
      %124 = vector.shape_cast %123 : vector<1x1x16x4xf32> to vector<16x4xf32>
      %125 = vector.extract_strided_slice %124 {offsets = [0, 0], sizes = [10, 4], strides = [1, 1]} : vector<16x4xf32> to vector<10x4xf32>
      %c21 = arith.constant 21 : index
      %c0_80 = arith.constant 0 : index
      %c0_81 = arith.constant 0 : index
      %126 = vector.load %arg2[%c21, %c0_80, %c0_81] : memref<49x4x8xf32, #tpu.memory_space<vmem>>, vector<1x4x8xf32>
      %127 = vector.shape_cast %126 : vector<1x4x8xf32> to vector<4x8xf32>
      %cst_82 = arith.constant dense<0.000000e+00> : vector<10x8xf32>
      %128 = tpu.matmul %125, %127, %cst_82 {dimension_numbers = #tpu.dot_dimension_numbers<[1], [0], [0], [1], [0, 0, 1, 1], [], []>} : vector<10x4xf32>, vector<4x8xf32>, vector<10x8xf32> -> vector<10x8xf32>
      %129 = arith.addf %120, %128 : vector<10x8xf32>
      %130 = vector.extract_strided_slice %124 {offsets = [1, 0], sizes = [10, 4], strides = [1, 1]} : vector<16x4xf32> to vector<10x4xf32>
      %c22 = arith.constant 22 : index
      %c0_83 = arith.constant 0 : index
      %c0_84 = arith.constant 0 : index
      %131 = vector.load %arg2[%c22, %c0_83, %c0_84] : memref<49x4x8xf32, #tpu.memory_space<vmem>>, vector<1x4x8xf32>
      %132 = vector.shape_cast %131 : vector<1x4x8xf32> to vector<4x8xf32>
      %cst_85 = arith.constant dense<0.000000e+00> : vector<10x8xf32>
      %133 = tpu.matmul %130, %132, %cst_85 {dimension_numbers = #tpu.dot_dimension_numbers<[1], [0], [0], [1], [0, 0, 1, 1], [], []>} : vector<10x4xf32>, vector<4x8xf32>, vector<10x8xf32> -> vector<10x8xf32>
      %134 = arith.addf %129, %133 : vector<10x8xf32>
      %135 = vector.extract_strided_slice %124 {offsets = [2, 0], sizes = [10, 4], strides = [1, 1]} : vector<16x4xf32> to vector<10x4xf32>
      %c23 = arith.constant 23 : index
      %c0_86 = arith.constant 0 : index
      %c0_87 = arith.constant 0 : index
      %136 = vector.load %arg2[%c23, %c0_86, %c0_87] : memref<49x4x8xf32, #tpu.memory_space<vmem>>, vector<1x4x8xf32>
      %137 = vector.shape_cast %136 : vector<1x4x8xf32> to vector<4x8xf32>
      %cst_88 = arith.constant dense<0.000000e+00> : vector<10x8xf32>
      %138 = tpu.matmul %135, %137, %cst_88 {dimension_numbers = #tpu.dot_dimension_numbers<[1], [0], [0], [1], [0, 0, 1, 1], [], []>} : vector<10x4xf32>, vector<4x8xf32>, vector<10x8xf32> -> vector<10x8xf32>
      %139 = arith.addf %134, %138 : vector<10x8xf32>
      %140 = vector.extract_strided_slice %124 {offsets = [3, 0], sizes = [10, 4], strides = [1, 1]} : vector<16x4xf32> to vector<10x4xf32>
      %c24 = arith.constant 24 : index
      %c0_89 = arith.constant 0 : index
      %c0_90 = arith.constant 0 : index
      %141 = vector.load %arg2[%c24, %c0_89, %c0_90] : memref<49x4x8xf32, #tpu.memory_space<vmem>>, vector<1x4x8xf32>
      %142 = vector.shape_cast %141 : vector<1x4x8xf32> to vector<4x8xf32>
      %cst_91 = arith.constant dense<0.000000e+00> : vector<10x8xf32>
      %143 = tpu.matmul %140, %142, %cst_91 {dimension_numbers = #tpu.dot_dimension_numbers<[1], [0], [0], [1], [0, 0, 1, 1], [], []>} : vector<10x4xf32>, vector<4x8xf32>, vector<10x8xf32> -> vector<10x8xf32>
      %144 = arith.addf %139, %143 : vector<10x8xf32>
      %145 = vector.extract_strided_slice %124 {offsets = [4, 0], sizes = [10, 4], strides = [1, 1]} : vector<16x4xf32> to vector<10x4xf32>
      %c25 = arith.constant 25 : index
      %c0_92 = arith.constant 0 : index
      %c0_93 = arith.constant 0 : index
      %146 = vector.load %arg2[%c25, %c0_92, %c0_93] : memref<49x4x8xf32, #tpu.memory_space<vmem>>, vector<1x4x8xf32>
      %147 = vector.shape_cast %146 : vector<1x4x8xf32> to vector<4x8xf32>
      %cst_94 = arith.constant dense<0.000000e+00> : vector<10x8xf32>
      %148 = tpu.matmul %145, %147, %cst_94 {dimension_numbers = #tpu.dot_dimension_numbers<[1], [0], [0], [1], [0, 0, 1, 1], [], []>} : vector<10x4xf32>, vector<4x8xf32>, vector<10x8xf32> -> vector<10x8xf32>
      %149 = arith.addf %144, %148 : vector<10x8xf32>
      %150 = vector.extract_strided_slice %124 {offsets = [5, 0], sizes = [10, 4], strides = [1, 1]} : vector<16x4xf32> to vector<10x4xf32>
      %c26 = arith.constant 26 : index
      %c0_95 = arith.constant 0 : index
      %c0_96 = arith.constant 0 : index
      %151 = vector.load %arg2[%c26, %c0_95, %c0_96] : memref<49x4x8xf32, #tpu.memory_space<vmem>>, vector<1x4x8xf32>
      %152 = vector.shape_cast %151 : vector<1x4x8xf32> to vector<4x8xf32>
      %cst_97 = arith.constant dense<0.000000e+00> : vector<10x8xf32>
      %153 = tpu.matmul %150, %152, %cst_97 {dimension_numbers = #tpu.dot_dimension_numbers<[1], [0], [0], [1], [0, 0, 1, 1], [], []>} : vector<10x4xf32>, vector<4x8xf32>, vector<10x8xf32> -> vector<10x8xf32>
      %154 = arith.addf %149, %153 : vector<10x8xf32>
      %155 = vector.extract_strided_slice %124 {offsets = [6, 0], sizes = [10, 4], strides = [1, 1]} : vector<16x4xf32> to vector<10x4xf32>
      %c27 = arith.constant 27 : index
      %c0_98 = arith.constant 0 : index
      %c0_99 = arith.constant 0 : index
      %156 = vector.load %arg2[%c27, %c0_98, %c0_99] : memref<49x4x8xf32, #tpu.memory_space<vmem>>, vector<1x4x8xf32>
      %157 = vector.shape_cast %156 : vector<1x4x8xf32> to vector<4x8xf32>
      %cst_100 = arith.constant dense<0.000000e+00> : vector<10x8xf32>
      %158 = tpu.matmul %155, %157, %cst_100 {dimension_numbers = #tpu.dot_dimension_numbers<[1], [0], [0], [1], [0, 0, 1, 1], [], []>} : vector<10x4xf32>, vector<4x8xf32>, vector<10x8xf32> -> vector<10x8xf32>
      %159 = arith.addf %154, %158 : vector<10x8xf32>
      %c4_i32 = arith.constant 4 : i32
      %160 = arith.addi %2, %c4_i32 : i32
      %c0_101 = arith.constant 0 : index
      %161 = arith.index_cast %160 : i32 to index
      %c0_102 = arith.constant 0 : index
      %c0_103 = arith.constant 0 : index
      %162 = vector.load %arg1[%c0_101, %161, %c0_102, %c0_103] : memref<1x16x16x4xf32, #tpu.memory_space<vmem>>, vector<1x1x16x4xf32>
      %163 = vector.shape_cast %162 : vector<1x1x16x4xf32> to vector<16x4xf32>
      %164 = vector.extract_strided_slice %163 {offsets = [0, 0], sizes = [10, 4], strides = [1, 1]} : vector<16x4xf32> to vector<10x4xf32>
      %c28 = arith.constant 28 : index
      %c0_104 = arith.constant 0 : index
      %c0_105 = arith.constant 0 : index
      %165 = vector.load %arg2[%c28, %c0_104, %c0_105] : memref<49x4x8xf32, #tpu.memory_space<vmem>>, vector<1x4x8xf32>
      %166 = vector.shape_cast %165 : vector<1x4x8xf32> to vector<4x8xf32>
      %cst_106 = arith.constant dense<0.000000e+00> : vector<10x8xf32>
      %167 = tpu.matmul %164, %166, %cst_106 {dimension_numbers = #tpu.dot_dimension_numbers<[1], [0], [0], [1], [0, 0, 1, 1], [], []>} : vector<10x4xf32>, vector<4x8xf32>, vector<10x8xf32> -> vector<10x8xf32>
      %168 = arith.addf %159, %167 : vector<10x8xf32>
      %169 = vector.extract_strided_slice %163 {offsets = [1, 0], sizes = [10, 4], strides = [1, 1]} : vector<16x4xf32> to vector<10x4xf32>
      %c29 = arith.constant 29 : index
      %c0_107 = arith.constant 0 : index
      %c0_108 = arith.constant 0 : index
      %170 = vector.load %arg2[%c29, %c0_107, %c0_108] : memref<49x4x8xf32, #tpu.memory_space<vmem>>, vector<1x4x8xf32>
      %171 = vector.shape_cast %170 : vector<1x4x8xf32> to vector<4x8xf32>
      %cst_109 = arith.constant dense<0.000000e+00> : vector<10x8xf32>
      %172 = tpu.matmul %169, %171, %cst_109 {dimension_numbers = #tpu.dot_dimension_numbers<[1], [0], [0], [1], [0, 0, 1, 1], [], []>} : vector<10x4xf32>, vector<4x8xf32>, vector<10x8xf32> -> vector<10x8xf32>
      %173 = arith.addf %168, %172 : vector<10x8xf32>
      %174 = vector.extract_strided_slice %163 {offsets = [2, 0], sizes = [10, 4], strides = [1, 1]} : vector<16x4xf32> to vector<10x4xf32>
      %c30 = arith.constant 30 : index
      %c0_110 = arith.constant 0 : index
      %c0_111 = arith.constant 0 : index
      %175 = vector.load %arg2[%c30, %c0_110, %c0_111] : memref<49x4x8xf32, #tpu.memory_space<vmem>>, vector<1x4x8xf32>
      %176 = vector.shape_cast %175 : vector<1x4x8xf32> to vector<4x8xf32>
      %cst_112 = arith.constant dense<0.000000e+00> : vector<10x8xf32>
      %177 = tpu.matmul %174, %176, %cst_112 {dimension_numbers = #tpu.dot_dimension_numbers<[1], [0], [0], [1], [0, 0, 1, 1], [], []>} : vector<10x4xf32>, vector<4x8xf32>, vector<10x8xf32> -> vector<10x8xf32>
      %178 = arith.addf %173, %177 : vector<10x8xf32>
      %179 = vector.extract_strided_slice %163 {offsets = [3, 0], sizes = [10, 4], strides = [1, 1]} : vector<16x4xf32> to vector<10x4xf32>
      %c31 = arith.constant 31 : index
      %c0_113 = arith.constant 0 : index
      %c0_114 = arith.constant 0 : index
      %180 = vector.load %arg2[%c31, %c0_113, %c0_114] : memref<49x4x8xf32, #tpu.memory_space<vmem>>, vector<1x4x8xf32>
      %181 = vector.shape_cast %180 : vector<1x4x8xf32> to vector<4x8xf32>
      %cst_115 = arith.constant dense<0.000000e+00> : vector<10x8xf32>
      %182 = tpu.matmul %179, %181, %cst_115 {dimension_numbers = #tpu.dot_dimension_numbers<[1], [0], [0], [1], [0, 0, 1, 1], [], []>} : vector<10x4xf32>, vector<4x8xf32>, vector<10x8xf32> -> vector<10x8xf32>
      %183 = arith.addf %178, %182 : vector<10x8xf32>
      %184 = vector.extract_strided_slice %163 {offsets = [4, 0], sizes = [10, 4], strides = [1, 1]} : vector<16x4xf32> to vector<10x4xf32>
      %c32 = arith.constant 32 : index
      %c0_116 = arith.constant 0 : index
      %c0_117 = arith.constant 0 : index
      %185 = vector.load %arg2[%c32, %c0_116, %c0_117] : memref<49x4x8xf32, #tpu.memory_space<vmem>>, vector<1x4x8xf32>
      %186 = vector.shape_cast %185 : vector<1x4x8xf32> to vector<4x8xf32>
      %cst_118 = arith.constant dense<0.000000e+00> : vector<10x8xf32>
      %187 = tpu.matmul %184, %186, %cst_118 {dimension_numbers = #tpu.dot_dimension_numbers<[1], [0], [0], [1], [0, 0, 1, 1], [], []>} : vector<10x4xf32>, vector<4x8xf32>, vector<10x8xf32> -> vector<10x8xf32>
      %188 = arith.addf %183, %187 : vector<10x8xf32>
      %189 = vector.extract_strided_slice %163 {offsets = [5, 0], sizes = [10, 4], strides = [1, 1]} : vector<16x4xf32> to vector<10x4xf32>
      %c33 = arith.constant 33 : index
      %c0_119 = arith.constant 0 : index
      %c0_120 = arith.constant 0 : index
      %190 = vector.load %arg2[%c33, %c0_119, %c0_120] : memref<49x4x8xf32, #tpu.memory_space<vmem>>, vector<1x4x8xf32>
      %191 = vector.shape_cast %190 : vector<1x4x8xf32> to vector<4x8xf32>
      %cst_121 = arith.constant dense<0.000000e+00> : vector<10x8xf32>
      %192 = tpu.matmul %189, %191, %cst_121 {dimension_numbers = #tpu.dot_dimension_numbers<[1], [0], [0], [1], [0, 0, 1, 1], [], []>} : vector<10x4xf32>, vector<4x8xf32>, vector<10x8xf32> -> vector<10x8xf32>
      %193 = arith.addf %188, %192 : vector<10x8xf32>
      %194 = vector.extract_strided_slice %163 {offsets = [6, 0], sizes = [10, 4], strides = [1, 1]} : vector<16x4xf32> to vector<10x4xf32>
      %c34 = arith.constant 34 : index
      %c0_122 = arith.constant 0 : index
      %c0_123 = arith.constant 0 : index
      %195 = vector.load %arg2[%c34, %c0_122, %c0_123] : memref<49x4x8xf32, #tpu.memory_space<vmem>>, vector<1x4x8xf32>
      %196 = vector.shape_cast %195 : vector<1x4x8xf32> to vector<4x8xf32>
      %cst_124 = arith.constant dense<0.000000e+00> : vector<10x8xf32>
      %197 = tpu.matmul %194, %196, %cst_124 {dimension_numbers = #tpu.dot_dimension_numbers<[1], [0], [0], [1], [0, 0, 1, 1], [], []>} : vector<10x4xf32>, vector<4x8xf32>, vector<10x8xf32> -> vector<10x8xf32>
      %198 = arith.addf %193, %197 : vector<10x8xf32>
      %c5_i32 = arith.constant 5 : i32
      %199 = arith.addi %2, %c5_i32 : i32
      %c0_125 = arith.constant 0 : index
      %200 = arith.index_cast %199 : i32 to index
      %c0_126 = arith.constant 0 : index
      %c0_127 = arith.constant 0 : index
      %201 = vector.load %arg1[%c0_125, %200, %c0_126, %c0_127] : memref<1x16x16x4xf32, #tpu.memory_space<vmem>>, vector<1x1x16x4xf32>
      %202 = vector.shape_cast %201 : vector<1x1x16x4xf32> to vector<16x4xf32>
      %203 = vector.extract_strided_slice %202 {offsets = [0, 0], sizes = [10, 4], strides = [1, 1]} : vector<16x4xf32> to vector<10x4xf32>
      %c35 = arith.constant 35 : index
      %c0_128 = arith.constant 0 : index
      %c0_129 = arith.constant 0 : index
      %204 = vector.load %arg2[%c35, %c0_128, %c0_129] : memref<49x4x8xf32, #tpu.memory_space<vmem>>, vector<1x4x8xf32>
      %205 = vector.shape_cast %204 : vector<1x4x8xf32> to vector<4x8xf32>
      %cst_130 = arith.constant dense<0.000000e+00> : vector<10x8xf32>
      %206 = tpu.matmul %203, %205, %cst_130 {dimension_numbers = #tpu.dot_dimension_numbers<[1], [0], [0], [1], [0, 0, 1, 1], [], []>} : vector<10x4xf32>, vector<4x8xf32>, vector<10x8xf32> -> vector<10x8xf32>
      %207 = arith.addf %198, %206 : vector<10x8xf32>
      %208 = vector.extract_strided_slice %202 {offsets = [1, 0], sizes = [10, 4], strides = [1, 1]} : vector<16x4xf32> to vector<10x4xf32>
      %c36 = arith.constant 36 : index
      %c0_131 = arith.constant 0 : index
      %c0_132 = arith.constant 0 : index
      %209 = vector.load %arg2[%c36, %c0_131, %c0_132] : memref<49x4x8xf32, #tpu.memory_space<vmem>>, vector<1x4x8xf32>
      %210 = vector.shape_cast %209 : vector<1x4x8xf32> to vector<4x8xf32>
      %cst_133 = arith.constant dense<0.000000e+00> : vector<10x8xf32>
      %211 = tpu.matmul %208, %210, %cst_133 {dimension_numbers = #tpu.dot_dimension_numbers<[1], [0], [0], [1], [0, 0, 1, 1], [], []>} : vector<10x4xf32>, vector<4x8xf32>, vector<10x8xf32> -> vector<10x8xf32>
      %212 = arith.addf %207, %211 : vector<10x8xf32>
      %213 = vector.extract_strided_slice %202 {offsets = [2, 0], sizes = [10, 4], strides = [1, 1]} : vector<16x4xf32> to vector<10x4xf32>
      %c37 = arith.constant 37 : index
      %c0_134 = arith.constant 0 : index
      %c0_135 = arith.constant 0 : index
      %214 = vector.load %arg2[%c37, %c0_134, %c0_135] : memref<49x4x8xf32, #tpu.memory_space<vmem>>, vector<1x4x8xf32>
      %215 = vector.shape_cast %214 : vector<1x4x8xf32> to vector<4x8xf32>
      %cst_136 = arith.constant dense<0.000000e+00> : vector<10x8xf32>
      %216 = tpu.matmul %213, %215, %cst_136 {dimension_numbers = #tpu.dot_dimension_numbers<[1], [0], [0], [1], [0, 0, 1, 1], [], []>} : vector<10x4xf32>, vector<4x8xf32>, vector<10x8xf32> -> vector<10x8xf32>
      %217 = arith.addf %212, %216 : vector<10x8xf32>
      %218 = vector.extract_strided_slice %202 {offsets = [3, 0], sizes = [10, 4], strides = [1, 1]} : vector<16x4xf32> to vector<10x4xf32>
      %c38 = arith.constant 38 : index
      %c0_137 = arith.constant 0 : index
      %c0_138 = arith.constant 0 : index
      %219 = vector.load %arg2[%c38, %c0_137, %c0_138] : memref<49x4x8xf32, #tpu.memory_space<vmem>>, vector<1x4x8xf32>
      %220 = vector.shape_cast %219 : vector<1x4x8xf32> to vector<4x8xf32>
      %cst_139 = arith.constant dense<0.000000e+00> : vector<10x8xf32>
      %221 = tpu.matmul %218, %220, %cst_139 {dimension_numbers = #tpu.dot_dimension_numbers<[1], [0], [0], [1], [0, 0, 1, 1], [], []>} : vector<10x4xf32>, vector<4x8xf32>, vector<10x8xf32> -> vector<10x8xf32>
      %222 = arith.addf %217, %221 : vector<10x8xf32>
      %223 = vector.extract_strided_slice %202 {offsets = [4, 0], sizes = [10, 4], strides = [1, 1]} : vector<16x4xf32> to vector<10x4xf32>
      %c39 = arith.constant 39 : index
      %c0_140 = arith.constant 0 : index
      %c0_141 = arith.constant 0 : index
      %224 = vector.load %arg2[%c39, %c0_140, %c0_141] : memref<49x4x8xf32, #tpu.memory_space<vmem>>, vector<1x4x8xf32>
      %225 = vector.shape_cast %224 : vector<1x4x8xf32> to vector<4x8xf32>
      %cst_142 = arith.constant dense<0.000000e+00> : vector<10x8xf32>
      %226 = tpu.matmul %223, %225, %cst_142 {dimension_numbers = #tpu.dot_dimension_numbers<[1], [0], [0], [1], [0, 0, 1, 1], [], []>} : vector<10x4xf32>, vector<4x8xf32>, vector<10x8xf32> -> vector<10x8xf32>
      %227 = arith.addf %222, %226 : vector<10x8xf32>
      %228 = vector.extract_strided_slice %202 {offsets = [5, 0], sizes = [10, 4], strides = [1, 1]} : vector<16x4xf32> to vector<10x4xf32>
      %c40 = arith.constant 40 : index
      %c0_143 = arith.constant 0 : index
      %c0_144 = arith.constant 0 : index
      %229 = vector.load %arg2[%c40, %c0_143, %c0_144] : memref<49x4x8xf32, #tpu.memory_space<vmem>>, vector<1x4x8xf32>
      %230 = vector.shape_cast %229 : vector<1x4x8xf32> to vector<4x8xf32>
      %cst_145 = arith.constant dense<0.000000e+00> : vector<10x8xf32>
      %231 = tpu.matmul %228, %230, %cst_145 {dimension_numbers = #tpu.dot_dimension_numbers<[1], [0], [0], [1], [0, 0, 1, 1], [], []>} : vector<10x4xf32>, vector<4x8xf32>, vector<10x8xf32> -> vector<10x8xf32>
      %232 = arith.addf %227, %231 : vector<10x8xf32>
      %233 = vector.extract_strided_slice %202 {offsets = [6, 0], sizes = [10, 4], strides = [1, 1]} : vector<16x4xf32> to vector<10x4xf32>
      %c41 = arith.constant 41 : index
      %c0_146 = arith.constant 0 : index
      %c0_147 = arith.constant 0 : index
      %234 = vector.load %arg2[%c41, %c0_146, %c0_147] : memref<49x4x8xf32, #tpu.memory_space<vmem>>, vector<1x4x8xf32>
      %235 = vector.shape_cast %234 : vector<1x4x8xf32> to vector<4x8xf32>
      %cst_148 = arith.constant dense<0.000000e+00> : vector<10x8xf32>
      %236 = tpu.matmul %233, %235, %cst_148 {dimension_numbers = #tpu.dot_dimension_numbers<[1], [0], [0], [1], [0, 0, 1, 1], [], []>} : vector<10x4xf32>, vector<4x8xf32>, vector<10x8xf32> -> vector<10x8xf32>
      %237 = arith.addf %232, %236 : vector<10x8xf32>
      %c6_i32 = arith.constant 6 : i32
      %238 = arith.addi %2, %c6_i32 : i32
      %c0_149 = arith.constant 0 : index
      %239 = arith.index_cast %238 : i32 to index
      %c0_150 = arith.constant 0 : index
      %c0_151 = arith.constant 0 : index
      %240 = vector.load %arg1[%c0_149, %239, %c0_150, %c0_151] : memref<1x16x16x4xf32, #tpu.memory_space<vmem>>, vector<1x1x16x4xf32>
      %241 = vector.shape_cast %240 : vector<1x1x16x4xf32> to vector<16x4xf32>
      %242 = vector.extract_strided_slice %241 {offsets = [0, 0], sizes = [10, 4], strides = [1, 1]} : vector<16x4xf32> to vector<10x4xf32>
      %c42 = arith.constant 42 : index
      %c0_152 = arith.constant 0 : index
      %c0_153 = arith.constant 0 : index
      %243 = vector.load %arg2[%c42, %c0_152, %c0_153] : memref<49x4x8xf32, #tpu.memory_space<vmem>>, vector<1x4x8xf32>
      %244 = vector.shape_cast %243 : vector<1x4x8xf32> to vector<4x8xf32>
      %cst_154 = arith.constant dense<0.000000e+00> : vector<10x8xf32>
      %245 = tpu.matmul %242, %244, %cst_154 {dimension_numbers = #tpu.dot_dimension_numbers<[1], [0], [0], [1], [0, 0, 1, 1], [], []>} : vector<10x4xf32>, vector<4x8xf32>, vector<10x8xf32> -> vector<10x8xf32>
      %246 = arith.addf %237, %245 : vector<10x8xf32>
      %247 = vector.extract_strided_slice %241 {offsets = [1, 0], sizes = [10, 4], strides = [1, 1]} : vector<16x4xf32> to vector<10x4xf32>
      %c43 = arith.constant 43 : index
      %c0_155 = arith.constant 0 : index
      %c0_156 = arith.constant 0 : index
      %248 = vector.load %arg2[%c43, %c0_155, %c0_156] : memref<49x4x8xf32, #tpu.memory_space<vmem>>, vector<1x4x8xf32>
      %249 = vector.shape_cast %248 : vector<1x4x8xf32> to vector<4x8xf32>
      %cst_157 = arith.constant dense<0.000000e+00> : vector<10x8xf32>
      %250 = tpu.matmul %247, %249, %cst_157 {dimension_numbers = #tpu.dot_dimension_numbers<[1], [0], [0], [1], [0, 0, 1, 1], [], []>} : vector<10x4xf32>, vector<4x8xf32>, vector<10x8xf32> -> vector<10x8xf32>
      %251 = arith.addf %246, %250 : vector<10x8xf32>
      %252 = vector.extract_strided_slice %241 {offsets = [2, 0], sizes = [10, 4], strides = [1, 1]} : vector<16x4xf32> to vector<10x4xf32>
      %c44 = arith.constant 44 : index
      %c0_158 = arith.constant 0 : index
      %c0_159 = arith.constant 0 : index
      %253 = vector.load %arg2[%c44, %c0_158, %c0_159] : memref<49x4x8xf32, #tpu.memory_space<vmem>>, vector<1x4x8xf32>
      %254 = vector.shape_cast %253 : vector<1x4x8xf32> to vector<4x8xf32>
      %cst_160 = arith.constant dense<0.000000e+00> : vector<10x8xf32>
      %255 = tpu.matmul %252, %254, %cst_160 {dimension_numbers = #tpu.dot_dimension_numbers<[1], [0], [0], [1], [0, 0, 1, 1], [], []>} : vector<10x4xf32>, vector<4x8xf32>, vector<10x8xf32> -> vector<10x8xf32>
      %256 = arith.addf %251, %255 : vector<10x8xf32>
      %257 = vector.extract_strided_slice %241 {offsets = [3, 0], sizes = [10, 4], strides = [1, 1]} : vector<16x4xf32> to vector<10x4xf32>
      %c45 = arith.constant 45 : index
      %c0_161 = arith.constant 0 : index
      %c0_162 = arith.constant 0 : index
      %258 = vector.load %arg2[%c45, %c0_161, %c0_162] : memref<49x4x8xf32, #tpu.memory_space<vmem>>, vector<1x4x8xf32>
      %259 = vector.shape_cast %258 : vector<1x4x8xf32> to vector<4x8xf32>
      %cst_163 = arith.constant dense<0.000000e+00> : vector<10x8xf32>
      %260 = tpu.matmul %257, %259, %cst_163 {dimension_numbers = #tpu.dot_dimension_numbers<[1], [0], [0], [1], [0, 0, 1, 1], [], []>} : vector<10x4xf32>, vector<4x8xf32>, vector<10x8xf32> -> vector<10x8xf32>
      %261 = arith.addf %256, %260 : vector<10x8xf32>
      %262 = vector.extract_strided_slice %241 {offsets = [4, 0], sizes = [10, 4], strides = [1, 1]} : vector<16x4xf32> to vector<10x4xf32>
      %c46 = arith.constant 46 : index
      %c0_164 = arith.constant 0 : index
      %c0_165 = arith.constant 0 : index
      %263 = vector.load %arg2[%c46, %c0_164, %c0_165] : memref<49x4x8xf32, #tpu.memory_space<vmem>>, vector<1x4x8xf32>
      %264 = vector.shape_cast %263 : vector<1x4x8xf32> to vector<4x8xf32>
      %cst_166 = arith.constant dense<0.000000e+00> : vector<10x8xf32>
      %265 = tpu.matmul %262, %264, %cst_166 {dimension_numbers = #tpu.dot_dimension_numbers<[1], [0], [0], [1], [0, 0, 1, 1], [], []>} : vector<10x4xf32>, vector<4x8xf32>, vector<10x8xf32> -> vector<10x8xf32>
      %266 = arith.addf %261, %265 : vector<10x8xf32>
      %267 = vector.extract_strided_slice %241 {offsets = [5, 0], sizes = [10, 4], strides = [1, 1]} : vector<16x4xf32> to vector<10x4xf32>
      %c47 = arith.constant 47 : index
      %c0_167 = arith.constant 0 : index
      %c0_168 = arith.constant 0 : index
      %268 = vector.load %arg2[%c47, %c0_167, %c0_168] : memref<49x4x8xf32, #tpu.memory_space<vmem>>, vector<1x4x8xf32>
      %269 = vector.shape_cast %268 : vector<1x4x8xf32> to vector<4x8xf32>
      %cst_169 = arith.constant dense<0.000000e+00> : vector<10x8xf32>
      %270 = tpu.matmul %267, %269, %cst_169 {dimension_numbers = #tpu.dot_dimension_numbers<[1], [0], [0], [1], [0, 0, 1, 1], [], []>} : vector<10x4xf32>, vector<4x8xf32>, vector<10x8xf32> -> vector<10x8xf32>
      %271 = arith.addf %266, %270 : vector<10x8xf32>
      %272 = vector.extract_strided_slice %241 {offsets = [6, 0], sizes = [10, 4], strides = [1, 1]} : vector<16x4xf32> to vector<10x4xf32>
      %c48 = arith.constant 48 : index
      %c0_170 = arith.constant 0 : index
      %c0_171 = arith.constant 0 : index
      %273 = vector.load %arg2[%c48, %c0_170, %c0_171] : memref<49x4x8xf32, #tpu.memory_space<vmem>>, vector<1x4x8xf32>
      %274 = vector.shape_cast %273 : vector<1x4x8xf32> to vector<4x8xf32>
      %cst_172 = arith.constant dense<0.000000e+00> : vector<10x8xf32>
      %275 = tpu.matmul %272, %274, %cst_172 {dimension_numbers = #tpu.dot_dimension_numbers<[1], [0], [0], [1], [0, 0, 1, 1], [], []>} : vector<10x4xf32>, vector<4x8xf32>, vector<10x8xf32> -> vector<10x8xf32>
      %276 = arith.addf %271, %275 : vector<10x8xf32>
      %c0_173 = arith.constant 0 : index
      %277 = arith.index_cast %2 : i32 to index
      %c0_174 = arith.constant 0 : index
      %c0_175 = arith.constant 0 : index
      %278 = vector.load %arg3[%c0_173, %277, %c0_174, %c0_175] : memref<1x10x10x8xf32, #tpu.memory_space<vmem>>, vector<1x1x10x8xf32>
      %279 = vector.shape_cast %278 : vector<1x1x10x8xf32> to vector<10x8xf32>
      %280 = vector.shape_cast %276 : vector<10x8xf32> to vector<1x1x10x8xf32>
      tpu.vector_store %arg3[%c0_173, %277, %c0_174, %c0_175], %280 {strides = array<i32>} : memref<1x10x10x8xf32, #tpu.memory_space<vmem>>, vector<1x1x10x8xf32>,
    }
    %c10_i32_0 = arith.constant 10 : i32
    return
  }
  func.func @transform_0(%arg0: i32) -> (i32, i32, i32, i32) {
    %c0_i32 = arith.constant 0 : i32
    %c0_i32_0 = arith.constant 0 : i32
    %c0_i32_1 = arith.constant 0 : i32
    %c0_i32_2 = arith.constant 0 : i32
    return %arg0, %c0_i32, %c0_i32_0, %c0_i32_1 : i32, i32, i32, i32
  }
  func.func @transform_1(%arg0: i32) -> (i32, i32, i32) {
    %c0_i32 = arith.constant 0 : i32
    %c0_i32_0 = arith.constant 0 : i32
    %c0_i32_1 = arith.constant 0 : i32
    %c0_i32_2 = arith.constant 0 : i32
    return %c0_i32, %c0_i32_0, %c0_i32_1 : i32, i32, i32
  }
  func.func @transform_2(%arg0: i32) -> (i32, i32, i32, i32) {
    %c0_i32 = arith.constant 0 : i32
    %c0_i32_0 = arith.constant 0 : i32
    %c0_i32_1 = arith.constant 0 : i32
    %c0_i32_2 = arith.constant 0 : i32
    return %arg0, %c0_i32, %c0_i32_0, %c0_i32_1 : i32, i32, i32, i32
  }
}

</mosaic_0001>

<bundles_post_ra>
// kernel: tpu_custom_call.1
= control target key start
LH: loop header
LB: loop body
LE: loop exit
PB: predicated region body
PF: predicated region fallthrough
CT: control target
= control target key end

     0   :  { %s2353_s9 = smov 0   ;;  %s2832_s0 = inlined_call_operand.vmem [shape: f32[2,16,16,4], index: 0, kind: input, shape index: {}]   ;;  %s2833_s1 = inlined_call_operand.vmem [shape: f32[49,4,8], index: 1, kind: input, shape index: {}]   ;;  %s2834_s2 = inlined_call_operand.vmem [shape: f32[2,10,10,8], index: 2, kind: output, shape index: {}]  }
   0x1 LB: > { %s2079_s10 = sadd.s32 4294967295, %s2332_s9   ;;  %p2083_p0 = scmp.ge.s32.totalorder %s2332_s9, 1  ;;  %s2332_s9 = sphi %s2353_s9, %s12_s9  }
   0x2   : > { %p112_p1 = scmp.lt.s32.totalorder %s2332_s9, 3 }
   0x4   : > { %p113_p2 = pnand %p2083_p0, %p112_p1 }
   0x5   : > { %p134_p3 = scmp.lt.s32.totalorder (!%p113_p2), %s2079_s10, 1  ;;  %s2371_s19 = smov (!%p113_p2), 0  }
   0x6   : > { %116 = sbr.rel (%p113_p2) target bundleno = 347 (0x15b), region = 28 }
   0xb   : > { %s2836_s10 = smov (!%p134_p3, %s2079_s10), 1 }
   0xc   : > { %s2303_s11 = sshll.u32 %s2836_s10, 8  ;;  %s2305_s12 = smul.u32 160, %s2836_s10 }
   0xd   : > { %s2364_s15 = scalar_lea.vmem %s2832_s0, %s2303_s11 }
   0xe   : > { %s2369_s18 = scalar_lea.vmem %s2834_s2, %s2305_s12 }
   0xf LB: >> { %v2088_v0 = vld [vmem:[%s2833_s1 + $0x4] sm:$0xf]  ;;  %vm168_vm0 = vcmask 1043456   ;;  %v154_v1 = vld [vmem:[%s2833_s1] sm:$0xf]  ;;  %s2087_s28 = sshll.u32 %s2336_s19, 4  ;;  %s2336_s19 = sphi %s2371_s19, %s149_s19  }
  0x10   : >> { %2304 = vmatpush.msk.msra.mxu1 %vm168_vm0, %v2088_v0  ;;  %v2095_v2 = vld [vmem:[%s2833_s1 + $0x8] sm:$0xf]  ;;  %v2111_v3 = vld [vmem:[%s2833_s1 + $0x18] sm:$0xf]  ;;  %2089 = vmatpush.msk.msra.mxu0 %vm168_vm0, %v2088_v0  ;;  %v2099_v4 = vld [vmem:[%s2833_s1 + $0xc] sm:$0xf]  ;;  %s2402_s5 = scalar_lea.vmem %s2364_s15, %s2087_s28 }
  0x11   : >> { %2096 = vmatpush.msk.msra.mxu2 %vm168_vm0, %v2095_v2  ;;  %v2103_v5 = vld [vmem:[%s2833_s1 + $0x10] sm:$0xf]  ;;  %2100 = vmatpush.msk.msra.mxu3 %vm168_vm0, %v2099_v4  ;;  %v2118_v6 = vld [vmem:[%s2833_s1 + $0x1c] sm:$0xf]  ;;  %v2410_v7 = vld [vmem:[%s2402_s5 + $0x8] sm:$0xff]  ;;  %vm163_vm1 = vcmask 31744  }
  0x12   : >> { %2092 = vmatpush.msk.msrb.mxu1 %vm168_vm0, %v154_v1  ;;  %v152_v8 = vld [vmem:[%s2402_s5] sm:$0xff]  ;;  %vm227_vm2 = vcmask 1045504   ;;  %vm159_vm3 = vcmask 1046528   ;;  %vm265_vm4 = vcmask 1044480   ;;  %2104 = vmatpush.msk.msrb.mxu0 %vm168_vm0, %v2103_v5  ;;  %v161_v9 = vrot.slane %v2410_v7, 1  ;;  %v2458_v30 = vld [vmem:[%s2402_s5 + $0x10] sm:$0xff] }
  0x13   : >> { %2112 = vmatpush.msk.msrb.mxu2 %vm168_vm0, %v2111_v3  ;;  %2119 = vmatpush.msk.msrb.mxu3 %vm168_vm0, %v2118_v6  ;;  %v228_v10 = vrot.slane %v152_v8, 2  ;;  %v229_v11 = vrot.slane %v2410_v7, 2  ;;  %v160_v12 = vrot.slane %v152_v8, 1  ;;  %v266_v13 = vrot.slane %v152_v8, 3  ;;  %v2107_v15 = vld [vmem:[%s2833_s1 + $0x14] sm:$0xf] }
  0x14   : >> { %v267_v14 = vrot.slane %v2410_v7, 3  ;;  %2091 = vmatmul.msk.f32.vlgmr.msra.gmra.mxu1 %vm163_vm1, %v161_v9  ;;  %v2122_v18 = vld [vmem:[%s2833_s1 + $0x20] sm:$0xf]  ;;  %v2130_v19 = vld [vmem:[%s2833_s1 + $0x28] sm:$0xf]  ;;  %v303_v22 = vrot.slane %v152_v8, 4 }
  0x15   : >> { %v230_v16 = vsel %vm227_vm2, %v228_v10, %v229_v11  ;;  %v162_v17 = vsel %vm159_vm3, %v160_v12, %v161_v9  ;;  %v2134_v21 = vld [vmem:[%s2833_s1 + $0x2c] sm:$0xf]  ;;  %2108 = vmatpush.msk.msra.mxu1 %vm168_vm0, %v2107_v15  ;;  %v304_v23 = vrot.slane %v2410_v7, 4  ;;  %v2126_v25 = vld [vmem:[%s2833_s1 + $0x24] sm:$0xf]  ;;  %v379_v27 = vrot.slane %v152_v8, 6 }
  0x16   : >> { %2097 = vmatmul.msk.f32.vlgmr.msra.gmra.mxu2 %vm163_vm1, %v230_v16  ;;  %2090 = vmatmul.msk.f32.vlgmr.msra.gmra.mxu0 %vm163_vm1, %v162_v17  ;;  %v268_v20 = vsel %vm265_vm4, %v266_v13, %v267_v14  ;;  %v2138_v26 = vld [vmem:[%s2833_s1 + $0x30] sm:$0xf]  ;;  %v380_v28 = vrot.slane %v2410_v7, 6  ;;  %vm378_vm5 = vcmask 1041408   ;;  %v2461_v31 = vld [vmem:[%s2402_s5 + $0x18] sm:$0xff]  ;;  %v341_v34 = vrot.slane %v152_v8, 5 }
  0x17   : >> { %2101 = vmatmul.msk.f32.vlgmr.msra.gmra.mxu3 %vm163_vm1, %v268_v20  ;;  %2123 = vmatpush.msk.msra.mxu0 %vm168_vm0, %v2122_v18  ;;  %v305_v24 = vsel %vm168_vm0, %v303_v22, %v304_v23  ;;  %v2149_v32 = vld [vmem:[%s2833_s1 + $0x38] sm:$0xf]  ;;  %v2153_v33 = vld [vmem:[%s2833_s1 + $0x3c] sm:$0xf]  ;;  %v342_v35 = vrot.slane %v2410_v7, 5  ;;  %vm340_vm6 = vcmask 1042432  }
  0x18   : >> { %2131 = vmatpush.msk.msra.mxu2 %vm168_vm0, %v2130_v19  ;;  %2135 = vmatpush.msk.msra.mxu3 %vm168_vm0, %v2134_v21  ;;  %v381_v29 = vsel %vm378_vm5, %v379_v27, %v380_v28  ;;  %v457_v36 = vrot.slane %v2458_v30, 1  ;;  %v458_v37 = vrot.slane %v2461_v31, 1  ;;  %v2142_v40 = vld [vmem:[%s2833_s1 + $0x34] sm:$0xf]  ;;  %v2157_v41 = vld [vmem:[%s2833_s1 + $0x40] sm:$0xf] }
  0x19   : >> { %v343_v38 = vsel %vm340_vm6, %v341_v34, %v342_v35  ;;  %v531_v42 = vrot.slane %v2458_v30, 3  ;;  %v532_v43 = vrot.slane %v2461_v31, 3  ;;  %v568_v44 = vrot.slane %v2458_v30, 4  ;;  %v2165_v48 = vld [vmem:[%s2833_s1 + $0x48] sm:$0xf]  ;;  %v2147_v57 = vld [vmem:[%s2402_s5 + $0x20] sm:$0xff] }
  0x1a   : >> { %v459_v39 = vsel %vm159_vm3, %v457_v36, %v458_v37  ;;  %v569_v45 = vrot.slane %v2461_v31, 4  ;;  %v2169_v49 = vld [vmem:[%s2833_s1 + $0x4c] sm:$0xf]  ;;  %v494_v50 = vrot.slane %v2458_v30, 2  ;;  %v495_v51 = vrot.slane %v2461_v31, 2  ;;  %s149_s19 = sadd.s32 1, %s2336_s19  }
  0x1b   : >> { %v533_v46 = vsel %vm265_vm4, %v531_v42, %v532_v43  ;;  %v605_v52 = vrot.slane %v2458_v30, 5  ;;  %v606_v53 = vrot.slane %v2461_v31, 5  ;;  %v2161_v56 = vld [vmem:[%s2833_s1 + $0x44] sm:$0xf]  ;;  %v2525_v58 = vld [vmem:[%s2402_s5 + $0x28] sm:$0xff]  ;;  %v720_v60 = vrot.slane %v2147_v57, 1 }
  0x1c   : >> { %2093 = vmatmul.msk.f32.vlgmr.msrb.gmra.mxu1 %vm163_vm1, %v152_v8  ;;  %v570_v47 = vsel %vm168_vm0, %v568_v44, %v569_v45  ;;  %v496_v54 = vsel %vm227_vm2, %v494_v50, %v495_v51  ;;  %v2173_v59 = vld [vmem:[%s2833_s1 + $0x50] sm:$0xf]  ;;  %v721_v61 = vrot.slane %v2525_v58, 1  ;;  %v2184_v63 = vld [vmem:[%s2833_s1 + $0x58] sm:$0xf]  ;;  %v642_v1 = vrot.slane %v2458_v30, 6 }
  0x1d   : >> { %2127 = vmatpush.msk.msrb.mxu1 %vm168_vm0, %v2126_v25  ;;  %v607_v55 = vsel %vm340_vm6, %v605_v52, %v606_v53  ;;  %v2188_v0 = vld [vmem:[%s2833_s1 + $0x5c] sm:$0xf]  ;;  %v643_v2 = vrot.slane %v2461_v31, 6  ;;  %v757_v3 = vrot.slane %v2147_v57, 2  ;;  %v758_v4 = vrot.slane %v2525_v58, 2  ;;  %v2654_v52 = vld [vmem:[%s2402_s5 + $0x48] sm:$0xff] }
  0x1e   : >> { %2098 = vmatmul.msk.f32.gmra.mxu2 %vm163_vm1, %v229_v11  ;;  %2105 = vmatmul.msk.f32.vlgmr.msrb.gmra.mxu0 %vm163_vm1, %v305_v24  ;;  %v722_v62 = vsel %vm159_vm3, %v720_v60, %v721_v61  ;;  %v2192_v8 = vld [vmem:[%s2833_s1 + $0x60] sm:$0xf]  ;;  %v831_v9 = vrot.slane %v2147_v57, 4  ;;  %v832_v10 = vrot.slane %v2525_v58, 4  ;;  %v868_v11 = vrot.slane %v2147_v57, 5  ;;  %v2589_v24 = vld [vmem:[%s2402_s5 + $0x38] sm:$0xff] }
  0x1f   : >> { %2102 = vmatmul.msk.f32.gmra.mxu3 %vm163_vm1, %v267_v14  ;;  %2139 = vmatpush.msk.msrb.mxu0 %vm168_vm0, %v2138_v26  ;;  %v644_v5 = vsel %vm378_vm5, %v642_v1, %v643_v2  ;;  %v759_v6 = vsel %vm227_vm2, %v757_v3, %v758_v4  ;;  %v869_v12 = vrot.slane %v2525_v58, 5  ;;  %v2200_v15 = vld [vmem:[%s2833_s1 + $0x68] sm:$0xf]  ;;  %v2204_v16 = vld [vmem:[%s2833_s1 + $0x6c] sm:$0xf]  ;;  %v794_v17 = vrot.slane %v2147_v57, 3 }
  0x20   : >> { %v833_v13 = vsel %vm168_vm0, %v831_v9, %v832_v10  ;;  %v795_v18 = vrot.slane %v2525_v58, 3  ;;  %v905_v19 = vrot.slane %v2147_v57, 6  ;;  %v906_v20 = vrot.slane %v2525_v58, 6  ;;  %v2196_v25 = vld [vmem:[%s2833_s1 + $0x64] sm:$0xf]  ;;  %p146_p4 = scmp.ge.s32.totalorder %s149_s19, 10  }
  0x21   : >> { %v870_v14 = vsel %vm340_vm6, %v868_v11, %v869_v12  ;;  %v2211_v26 = vld [vmem:[%s2833_s1 + $0x70] sm:$0xf]  ;;  %v2223_v34 = vld [vmem:[%s2833_s1 + $0x7c] sm:$0xf]  ;;  %v1058_v36 = vrot.slane %v2589_v24, 3  ;;  %vm1993_vm7 = vcmask 64512  }
  0x22   : >> { %v796_v21 = vsel %vm265_vm4, %v794_v17, %v795_v18  ;;  %v907_v22 = vsel %vm378_vm5, %v905_v19, %v906_v20  ;;  %v1395_v17 = vrot.slane %v2654_v52, 5  ;;  %vm1995_vm8 = vcmask 58368  }
  0x24   : >> { %2094 = vmatmul.msk.f32.gmra.mxu1 %vm163_vm1, %v2410_v7  ;;  %v2180_v7 = vld [vmem:[%s2833_s1 + $0x54] sm:$0xf] }
  0x26   : >> { %2113 = vmatmul.msk.f32.vlgmr.msrb.gmra.mxu2 %vm163_vm1, %v381_v29  ;;  %2106 = vmatmul.msk.f32.gmra.mxu0 %vm163_vm1, %v304_v23  ;;  %v2178_v23 = vld [vmem:[%s2402_s5 + $0x30] sm:$0xff] }
  0x27   : >> { %2120 = vmatmul.msk.f32.vlgmr.msrb.gmra.mxu3 %vm163_vm1, %v2458_v30  ;;  %2150 = vmatpush.msk.msrb.mxu2 %vm168_vm0, %v2149_v32  ;;  %v983_v27 = vrot.slane %v2178_v23, 1  ;;  %v1020_v29 = vrot.slane %v2178_v23, 2  ;;  %v1021_v30 = vrot.slane %v2589_v24, 2  ;;  %v1168_v42 = vrot.slane %v2178_v23, 6 }
  0x28   : >> { %2154 = vmatpush.msk.msrb.mxu3 %vm168_vm0, %v2153_v33  ;;  %v2219_v33 = vld [vmem:[%s2833_s1 + $0x78] sm:$0xf] }
  0x29   : >> { %v1022_v32 = vsel %vm227_vm2, %v1020_v29, %v1021_v30  ;;  %v2281_v29 = vld [vmem:[%s2833_s1 + $0xb0] sm:$0xf] }
  0x2c   : >> { %2109 = vmatmul.msk.f32.vlgmr.msra.gmra.mxu1 %vm163_vm1, %v343_v38  ;;  %v2215_v38 = vld [vmem:[%s2833_s1 + $0x74] sm:$0xf] }
  0x2d   : >> { %2143 = vmatpush.msk.msra.mxu1 %vm168_vm0, %v2142_v40  ;;  %v1131_v40 = vrot.slane %v2178_v23, 5 }
  0x2e   : >> { %2114 = vmatmul.msk.f32.gmra.mxu2 %vm163_vm1, %v380_v28  ;;  %2124 = vmatmul.msk.f32.vlgmr.msra.gmra.mxu0 %vm163_vm1, %v459_v39  ;;  %v984_v28 = vrot.slane %v2589_v24, 1  ;;  %v2227_v39 = vld [vmem:[%s2833_s1 + $0x80] sm:$0xf] }
  0x2f   : >> { %2121 = vmatmul.msk.f32.gmra.mxu3 %vm163_vm1, %v2461_v31  ;;  %2158 = vmatpush.msk.msra.mxu0 %vm168_vm0, %v2157_v41  ;;  %v1132_v41 = vrot.slane %v2589_v24, 5 }
  0x30   : >> { %v985_v31 = vsel %vm159_vm3, %v983_v27, %v984_v28  ;;  %v2266_v27 = vld [vmem:[%s2833_s1 + $0xa4] sm:$0xf] }
  0x31   : >> { %v1133_v44 = vsel %vm340_vm6, %v1131_v40, %v1132_v41 }
  0x34   : >> { %2110 = vmatmul.msk.f32.gmra.mxu1 %vm163_vm1, %v342_v35  ;;  %v1057_v35 = vrot.slane %v2178_v23, 3 }
  0x36   : >> { %2132 = vmatmul.msk.f32.vlgmr.msra.gmra.mxu2 %vm163_vm1, %v533_v46  ;;  %2125 = vmatmul.msk.f32.gmra.mxu0 %vm163_vm1, %v458_v37  ;;  %v1059_v37 = vsel %vm265_vm4, %v1057_v35, %v1058_v36  ;;  %v2235_v46 = vld [vmem:[%s2833_s1 + $0x88] sm:$0xf] }
  0x37   : >> { %2136 = vmatmul.msk.f32.vlgmr.msra.gmra.mxu3 %vm163_vm1, %v570_v47  ;;  %2166 = vmatpush.msk.msra.mxu2 %vm168_vm0, %v2165_v48  ;;  %v2242_v47 = vld [vmem:[%s2833_s1 + $0x8c] sm:$0xf]  ;;  %v1094_v48 = vrot.slane %v2178_v23, 4 }
  0x38   : >> { %2170 = vmatpush.msk.msra.mxu3 %vm168_vm0, %v2169_v49  ;;  %v1095_v49 = vrot.slane %v2589_v24, 4 }
  0x3a   : >> { %v1096_v50 = vsel %vm168_vm0, %v1094_v48, %v1095_v49 }
  0x3c   : >> { %2128 = vmatmul.msk.f32.vlgmr.msrb.gmra.mxu1 %vm163_vm1, %v496_v54  ;;  %v2246_v54 = vld [vmem:[%s2833_s1 + $0x90] sm:$0xf] }
  0x3d   : >> { %2162 = vmatpush.msk.msrb.mxu1 %vm168_vm0, %v2161_v56  ;;  %v1284_v56 = vrot.slane %v2654_v52, 2 }
  0x3e   : >> { %2133 = vmatmul.msk.f32.gmra.mxu2 %vm163_vm1, %v532_v43  ;;  %2140 = vmatmul.msk.f32.vlgmr.msrb.gmra.mxu0 %vm163_vm1, %v607_v55  ;;  %v1169_v43 = vrot.slane %v2589_v24, 6 }
  0x3f   : >> { %2137 = vmatmul.msk.f32.gmra.mxu3 %vm163_vm1, %v569_v45  ;;  %2174 = vmatpush.msk.msrb.mxu0 %vm168_vm0, %v2173_v59 }
  0x40   : >> { %v1170_v45 = vsel %vm378_vm5, %v1168_v42, %v1169_v43 }
  0x44   : >> { %2129 = vmatmul.msk.f32.gmra.mxu1 %vm163_vm1, %v495_v51  ;;  %v2209_v51 = vld [vmem:[%s2402_s5 + $0x40] sm:$0xff] }
  0x45   : >> { %v1283_v55 = vrot.slane %v2209_v51, 2  ;;  %v1357_v1 = vrot.slane %v2209_v51, 4 }
  0x46   : >> { %2151 = vmatmul.msk.f32.vlgmr.msrb.gmra.mxu2 %vm163_vm1, %v2147_v57  ;;  %2141 = vmatmul.msk.f32.gmra.mxu0 %vm163_vm1, %v606_v53  ;;  %v2231_v53 = vld [vmem:[%s2833_s1 + $0x84] sm:$0xf]  ;;  %v1320_v57 = vrot.slane %v2209_v51, 3 }
  0x47   : >> { %2155 = vmatmul.msk.f32.vlgmr.msrb.gmra.mxu3 %vm163_vm1, %v722_v62  ;;  %2185 = vmatpush.msk.msrb.mxu2 %vm168_vm0, %v2184_v63  ;;  %v1285_v59 = vsel %vm227_vm2, %v1283_v55, %v1284_v56  ;;  %v2258_v62 = vld [vmem:[%s2833_s1 + $0x9c] sm:$0xf]  ;;  %v1246_v63 = vrot.slane %v2209_v51, 1 }
  0x48   : >> { %2189 = vmatpush.msk.msrb.mxu3 %vm168_vm0, %v2188_v0  ;;  %v1247_v0 = vrot.slane %v2654_v52, 1 }
  0x4a   : >> { %v1248_v3 = vsel %vm159_vm3, %v1246_v63, %v1247_v0  ;;  %v2297_v63 = vld [vmem:[%s2833_s1 + $0xc0] sm:$0xf] }
  0x4c   : >> { %2144 = vmatmul.msk.f32.vlgmr.msra.gmra.mxu1 %vm163_vm1, %v644_v5  ;;  %v2250_v5 = vld [vmem:[%s2833_s1 + $0x94] sm:$0xf] }
  0x4d   : >> { %2181 = vmatpush.msk.msra.mxu1 %vm168_vm0, %v2180_v7  ;;  %v1431_v7 = vrot.slane %v2209_v51, 6 }
  0x4e   : >> { %2152 = vmatmul.msk.f32.gmra.mxu2 %vm163_vm1, %v2525_v58  ;;  %2159 = vmatmul.msk.f32.vlgmr.msra.gmra.mxu0 %vm163_vm1, %v759_v6  ;;  %v1321_v58 = vrot.slane %v2654_v52, 3  ;;  %v2262_v6 = vld [vmem:[%s2833_s1 + $0xa0] sm:$0xf] }
  0x4f   : >> { %2156 = vmatmul.msk.f32.gmra.mxu3 %vm163_vm1, %v721_v61  ;;  %2193 = vmatpush.msk.msra.mxu0 %vm168_vm0, %v2192_v8  ;;  %v2254_v61 = vld [vmem:[%s2833_s1 + $0x98] sm:$0xf]  ;;  %v1432_v8 = vrot.slane %v2654_v52, 6 }
  0x50   : >> { %v1322_v60 = vsel %vm265_vm4, %v1320_v57, %v1321_v58 }
  0x51   : >> { %v1433_v11 = vsel %vm378_vm5, %v1431_v7, %v1432_v8 }
  0x54   : >> { %2145 = vmatmul.msk.f32.gmra.mxu1 %vm163_vm1, %v643_v2  ;;  %v1358_v2 = vrot.slane %v2654_v52, 4 }
  0x56   : >> { %2167 = vmatmul.msk.f32.vlgmr.msra.gmra.mxu2 %vm163_vm1, %v833_v13  ;;  %2160 = vmatmul.msk.f32.gmra.mxu0 %vm163_vm1, %v758_v4  ;;  %v1359_v4 = vsel %vm168_vm0, %v1357_v1, %v1358_v2  ;;  %v2707_v13 = vld [vmem:[%s2402_s5 + $0x58] sm:$0xff] }
  0x57   : >> { %2171 = vmatmul.msk.f32.vlgmr.msra.gmra.mxu3 %vm163_vm1, %v870_v14  ;;  %2201 = vmatpush.msk.msra.mxu2 %vm168_vm0, %v2200_v15  ;;  %v2273_v14 = vld [vmem:[%s2833_s1 + $0xa8] sm:$0xf]  ;;  %v2277_v15 = vld [vmem:[%s2833_s1 + $0xac] sm:$0xf]  ;;  %v1510_v19 = vrot.slane %v2707_v13, 1 }
  0x58   : >> { %2205 = vmatpush.msk.msra.mxu3 %vm168_vm0, %v2204_v16  ;;  %v1394_v16 = vrot.slane %v2209_v51, 5 }
  0x5c   : >> { %2163 = vmatmul.msk.f32.vlgmr.msrb.gmra.mxu1 %vm163_vm1, %v796_v21 }
  0x5d   : >> { %2197 = vmatpush.msk.msrb.mxu1 %vm168_vm0, %v2196_v25 }
  0x5e   : >> { %2168 = vmatmul.msk.f32.gmra.mxu2 %vm163_vm1, %v832_v10  ;;  %2175 = vmatmul.msk.f32.vlgmr.msrb.gmra.mxu0 %vm163_vm1, %v907_v22  ;;  %v1396_v22 = vsel %vm340_vm6, %v1394_v16, %v1395_v17 }
  0x5f   : >> { %2172 = vmatmul.msk.f32.gmra.mxu3 %vm163_vm1, %v869_v12  ;;  %2212 = vmatpush.msk.msrb.mxu0 %vm168_vm0, %v2211_v26  ;;  %v2704_v12 = vld [vmem:[%s2402_s5 + $0x50] sm:$0xff] }
  0x64   : >> { %2164 = vmatmul.msk.f32.gmra.mxu1 %vm163_vm1, %v795_v18  ;;  %v1509_v18 = vrot.slane %v2704_v12, 1 }
  0x66   : >> { %2186 = vmatmul.msk.f32.vlgmr.msrb.gmra.mxu2 %vm163_vm1, %v985_v31  ;;  %2176 = vmatmul.msk.f32.gmra.mxu0 %vm163_vm1, %v906_v20  ;;  %v1511_v26 = vsel %vm159_vm3, %v1509_v18, %v1510_v19  ;;  %v1583_v31 = vrot.slane %v2704_v12, 3 }
  0x67   : >> { %2190 = vmatmul.msk.f32.vlgmr.msrb.gmra.mxu3 %vm163_vm1, %v1022_v32  ;;  %2220 = vmatpush.msk.msrb.mxu2 %vm168_vm0, %v2219_v33  ;;  %v1584_v32 = vrot.slane %v2707_v13, 3  ;;  %v1620_v33 = vrot.slane %v2704_v12, 4 }
  0x68   : >> { %2224 = vmatpush.msk.msrb.mxu3 %vm168_vm0, %v2223_v34  ;;  %v1621_v34 = vrot.slane %v2707_v13, 4 }
  0x6a   : >> { %v1622_v42 = vsel %vm168_vm0, %v1620_v33, %v1621_v34 }
  0x6c   : >> { %2182 = vmatmul.msk.f32.vlgmr.msra.gmra.mxu1 %vm163_vm1, %v2178_v23 }
  0x6d   : >> { %2216 = vmatpush.msk.msra.mxu1 %vm168_vm0, %v2215_v38 }
  0x6e   : >> { %2187 = vmatmul.msk.f32.gmra.mxu2 %vm163_vm1, %v984_v28  ;;  %2194 = vmatmul.msk.f32.vlgmr.msra.gmra.mxu0 %vm163_vm1, %v1059_v37 }
  0x6f   : >> { %2191 = vmatmul.msk.f32.gmra.mxu3 %vm163_vm1, %v1021_v30  ;;  %2228 = vmatpush.msk.msra.mxu0 %vm168_vm0, %v2227_v39 }
  0x74   : >> { %2183 = vmatmul.msk.f32.gmra.mxu1 %vm163_vm1, %v2589_v24 }
  0x76   : >> { %2202 = vmatmul.msk.f32.vlgmr.msra.gmra.mxu2 %vm163_vm1, %v1133_v44  ;;  %2195 = vmatmul.msk.f32.gmra.mxu0 %vm163_vm1, %v1058_v36 }
  0x77   : >> { %2206 = vmatmul.msk.f32.vlgmr.msra.gmra.mxu3 %vm163_vm1, %v1170_v45  ;;  %2236 = vmatpush.msk.msra.mxu2 %vm168_vm0, %v2235_v46  ;;  %v2293_v45 = vld [vmem:[%s2833_s1 + $0xbc] sm:$0xf]  ;;  %v1546_v46 = vrot.slane %v2704_v12, 2 }
  0x78   : >> { %2243 = vmatpush.msk.msra.mxu3 %vm168_vm0, %v2242_v47  ;;  %v1547_v47 = vrot.slane %v2707_v13, 2 }
  0x7c   : >> { %2198 = vmatmul.msk.f32.vlgmr.msrb.gmra.mxu1 %vm163_vm1, %v1096_v50  ;;  %v1658_v50 = vrot.slane %v2707_v13, 5 }
  0x7d   : >> { %2232 = vmatpush.msk.msrb.mxu1 %vm168_vm0, %v2231_v53 }
  0x7e   : >> { %2203 = vmatmul.msk.f32.gmra.mxu2 %vm163_vm1, %v1132_v41  ;;  %2213 = vmatmul.msk.f32.vlgmr.msrb.gmra.mxu0 %vm163_vm1, %v2209_v51  ;;  %v1585_v41 = vsel %vm265_vm4, %v1583_v31, %v1584_v32 }
  0x7f   : >> { %2207 = vmatmul.msk.f32.gmra.mxu3 %vm163_vm1, %v1169_v43  ;;  %2247 = vmatpush.msk.msrb.mxu0 %vm168_vm0, %v2246_v54  ;;  %v2289_v43 = vld [vmem:[%s2833_s1 + $0xb8] sm:$0xf]  ;;  %v1548_v54 = vsel %vm227_vm2, %v1546_v46, %v1547_v47 }
  0x84   : >> { %2199 = vmatmul.msk.f32.gmra.mxu1 %vm163_vm1, %v1095_v49  ;;  %v1657_v49 = vrot.slane %v2704_v12, 5 }
  0x86   : >> { %2221 = vmatmul.msk.f32.vlgmr.msrb.gmra.mxu2 %vm163_vm1, %v1285_v59  ;;  %2214 = vmatmul.msk.f32.gmra.mxu0 %vm163_vm1, %v2654_v52  ;;  %v2285_v59 = vld [vmem:[%s2833_s1 + $0xb4] sm:$0xf] }
  0x87   : >> { %2225 = vmatmul.msk.f32.vlgmr.msrb.gmra.mxu3 %vm163_vm1, %v1322_v60  ;;  %2255 = vmatpush.msk.msrb.mxu2 %vm168_vm0, %v2254_v61  ;;  %v2769_v61 = vld [vmem:[%s2402_s5 + $0x60] sm:$0xff] }
  0x88   : >> { %2259 = vmatpush.msk.msrb.mxu3 %vm168_vm0, %v2258_v62  ;;  %v2772_v62 = vld [vmem:[%s2402_s5 + $0x68] sm:$0xff]  ;;  %v1772_v1 = vrot.slane %v2769_v61, 1  ;;  %v1809_v16 = vrot.slane %v2769_v61, 2  ;;  %s1992_s5 = scalar_lea.vmem %s2369_s18, %s2087_s28 }
  0x8c   : >> { %2217 = vmatmul.msk.f32.vlgmr.msra.gmra.mxu1 %vm163_vm1, %v1248_v3 }
  0x8d   : >> { %2251 = vmatpush.msk.msra.mxu1 %vm168_vm0, %v2250_v5 }
  0x8e   : >> { %2222 = vmatmul.msk.f32.gmra.mxu2 %vm163_vm1, %v1284_v56  ;;  %2229 = vmatmul.msk.f32.vlgmr.msra.gmra.mxu0 %vm163_vm1, %v1359_v4 }
  0x8f   : >> { %2226 = vmatmul.msk.f32.gmra.mxu3 %vm163_vm1, %v1321_v58  ;;  %2263 = vmatpush.msk.msra.mxu0 %vm168_vm0, %v2262_v6  ;;  %v1659_v58 = vsel %vm340_vm6, %v1657_v49, %v1658_v50 }
  0x91   : >> { %v192_v9 = vpop.f32.mrf.mxu1 }
  0x93   : >> { %v189_v10 = vpop.f32.mrf.mxu0 }
  0x94   : >> { %2218 = vmatmul.msk.f32.gmra.mxu1 %vm163_vm1, %v1247_v0 }
  0x96   : >> { %2237 = vmatmul.msk.f32.vlgmr.msra.gmra.mxu2 %vm163_vm1, %v1433_v11  ;;  %2230 = vmatmul.msk.f32.gmra.mxu0 %vm163_vm1, %v1358_v2  ;;  %v1773_v2 = vrot.slane %v2772_v62, 1  ;;  %v1694_v11 = vrot.slane %v2704_v12, 6 }
  0x97   : >> { %2244 = vmatmul.msk.f32.vlgmr.msra.gmra.mxu3 %vm163_vm1, %v2704_v12  ;;  %2274 = vmatpush.msk.msra.mxu2 %vm168_vm0, %v2273_v14  ;;  %v1695_v14 = vrot.slane %v2707_v13, 6 }
  0x98   : >> { %2278 = vmatpush.msk.msra.mxu3 %vm168_vm0, %v2277_v15 }
  0x99   : >> { %v255_v20 = vpop.f32.mrf.mxu2  ;;  %v219_v21 = vpop.f32.mrf.mxu1 }
  0x9a   : >> { %v293_v23 = vpop.f32.mrf.mxu3  ;;  %v220_v24 = vadd.f32 %v219_v21, %v189_v10  ;;  %v1696_v21 = vsel %vm378_vm5, %v1694_v11, %v1695_v14 }
  0x9b   : >> { %v330_v25 = vpop.f32.mrf.mxu0 }
  0x9c   : >> { %v261_v28 = vadd.f32 %v255_v20, %v220_v24  ;;  %2233 = vmatmul.msk.f32.vlgmr.msrb.gmra.mxu1 %vm163_vm1, %v1396_v22 }
  0x9d   : >> { %2267 = vmatpush.msk.msrb.mxu1 %vm168_vm0, %v2266_v27  ;;  %v1884_v27 = vrot.slane %v2772_v62, 4 }
  0x9e   : >> { %2238 = vmatmul.msk.f32.gmra.mxu2 %vm163_vm1, %v1432_v8  ;;  %2248 = vmatmul.msk.f32.vlgmr.msrb.gmra.mxu0 %vm163_vm1, %v1511_v26  ;;  %v299_v30 = vadd.f32 %v293_v23, %v261_v28  ;;  %v1883_v26 = vrot.slane %v2769_v61, 4  ;;  %v1920_v28 = vrot.slane %v2769_v61, 5 }
  0x9f   : >> { %2245 = vmatmul.msk.f32.gmra.mxu3 %vm163_vm1, %v2707_v13  ;;  %2282 = vmatpush.msk.msrb.mxu0 %vm168_vm0, %v2281_v29  ;;  %v1921_v29 = vrot.slane %v2772_v62, 5 }
  0xa0   : >> { %v336_v35 = vadd.f32 %v330_v25, %v299_v30 }
  0xa1   : >> { %v258_v36 = vpop.f32.mrf.mxu2  ;;  %v222_v37 = vpop.f32.mrf.mxu1 }
  0xa2   : >> { %v296_v38 = vpop.f32.mrf.mxu3  ;;  %v223_v39 = vadd.f32 %v222_v37, %v192_v9  ;;  %v1774_v9 = vsel %vm159_vm3, %v1772_v1, %v1773_v2  ;;  %v1922_v37 = vsel %vm340_vm6, %v1920_v28, %v1921_v29 }
  0xa3   : >> { %v333_v40 = vpop.f32.mrf.mxu0 }
  0xa4   : >> { %v262_v44 = vadd.f32 %v258_v36, %v223_v39  ;;  %2234 = vmatmul.msk.f32.gmra.mxu1 %vm163_vm1, %v1395_v17  ;;  %v1810_v17 = vrot.slane %v2772_v62, 2  ;;  %v1885_v36 = vsel %vm168_vm0, %v1883_v26, %v1884_v27  ;;  %v1846_v39 = vrot.slane %v2769_v61, 3 }
  0xa6   : >> { %2256 = vmatmul.msk.f32.vlgmr.msrb.gmra.mxu2 %vm163_vm1, %v1585_v41  ;;  %2249 = vmatmul.msk.f32.gmra.mxu0 %vm163_vm1, %v1510_v19  ;;  %v300_v48 = vadd.f32 %v296_v38, %v262_v44  ;;  %v1811_v25 = vsel %vm227_vm2, %v1809_v16, %v1810_v17 }
  0xa7   : >> { %2260 = vmatmul.msk.f32.vlgmr.msrb.gmra.mxu3 %vm163_vm1, %v1622_v42  ;;  %2290 = vmatpush.msk.msrb.mxu2 %vm168_vm0, %v2289_v43  ;;  %v1957_v42 = vrot.slane %v2769_v61, 6  ;;  %v1958_v43 = vrot.slane %v2772_v62, 6 }
  0xa8   : >> { %2294 = vmatpush.msk.msrb.mxu3 %vm168_vm0, %v2293_v45  ;;  %v337_v51 = vadd.f32 %v333_v40, %v300_v48  ;;  %v1847_v40 = vrot.slane %v2772_v62, 3 }
  0xa9   : >> { %v406_v52 = vpop.f32.mrf.mxu2  ;;  %v368_v53 = vpop.f32.mrf.mxu1 }
  0xaa   : >> { %v447_v55 = vpop.f32.mrf.mxu3  ;;  %v374_v56 = vadd.f32 %v368_v53, %v336_v35 }
  0xab   : >> { %v484_v57 = vpop.f32.mrf.mxu0 }
  0xac   : >> { %v412_v60 = vadd.f32 %v406_v52, %v374_v56  ;;  %2252 = vmatmul.msk.f32.vlgmr.msra.gmra.mxu1 %vm163_vm1, %v1548_v54 }
  0xad   : >> { %2286 = vmatpush.msk.msra.mxu1 %vm168_vm0, %v2285_v59 }
  0xae   : >> { %2257 = vmatmul.msk.f32.gmra.mxu2 %vm163_vm1, %v1584_v32  ;;  %2264 = vmatmul.msk.f32.vlgmr.msra.gmra.mxu0 %vm163_vm1, %v1659_v58  ;;  %v453_v0 = vadd.f32 %v447_v55, %v412_v60 }
  0xaf   : >> { %2261 = vmatmul.msk.f32.gmra.mxu3 %vm163_vm1, %v1621_v34  ;;  %2298 = vmatpush.msk.msra.mxu0 %vm168_vm0, %v2297_v63 }
  0xb0   : >> { %v490_v3 = vadd.f32 %v484_v57, %v453_v0 }
  0xb1   : >> { %v409_v4 = vpop.f32.mrf.mxu2  ;;  %v371_v5 = vpop.f32.mrf.mxu1 }
  0xb2   : >> { %v450_v6 = vpop.f32.mrf.mxu3  ;;  %v375_v7 = vadd.f32 %v371_v5, %v337_v51  ;;  %v1959_v51 = vsel %vm378_vm5, %v1957_v42, %v1958_v43 }
  0xb3   : >> { %v487_v8 = vpop.f32.mrf.mxu0 }
  0xb4   : >> { %v413_v10 = vadd.f32 %v409_v4, %v375_v7  ;;  %2253 = vmatmul.msk.f32.gmra.mxu1 %vm163_vm1, %v1547_v47  ;;  %v1848_v47 = vsel %vm265_vm4, %v1846_v39, %v1847_v40 }
  0xb6   : >> { %2275 = vmatmul.msk.f32.vlgmr.msra.gmra.mxu2 %vm163_vm1, %v2769_v61  ;;  %2265 = vmatmul.msk.f32.gmra.mxu0 %vm163_vm1, %v1658_v50  ;;  %v454_v15 = vadd.f32 %v450_v6, %v413_v10 }
  0xb7   : >> { %2279 = vmatmul.msk.f32.vlgmr.msra.gmra.mxu3 %vm163_vm1, %v1774_v9 }
  0xb8   : >> { %v491_v18 = vadd.f32 %v487_v8, %v454_v15 }
  0xb9   : >> { %v558_v19 = vpop.f32.mrf.mxu2  ;;  %v521_v20 = vpop.f32.mrf.mxu1 }
  0xba   : >> { %v595_v22 = vpop.f32.mrf.mxu3  ;;  %v527_v23 = vadd.f32 %v521_v20, %v490_v3 }
  0xbb   : >> { %v632_v24 = vpop.f32.mrf.mxu0 }
  0xbc   : >> { %v564_v12 = vadd.f32 %v558_v19, %v527_v23  ;;  %2268 = vmatmul.msk.f32.vlgmr.msrb.gmra.mxu1 %vm163_vm1, %v1696_v21 }
  0xbe   : >> { %2276 = vmatmul.msk.f32.gmra.mxu2 %vm163_vm1, %v2772_v62  ;;  %2283 = vmatmul.msk.f32.vlgmr.msrb.gmra.mxu0 %vm163_vm1, %v1811_v25  ;;  %v601_v13 = vadd.f32 %v595_v22, %v564_v12 }
  0xbf   : >> { %2280 = vmatmul.msk.f32.gmra.mxu3 %vm163_vm1, %v1773_v2 }
  0xc0   : >> { %v638_v30 = vadd.f32 %v632_v24, %v601_v13 }
  0xc1   : >> { %v561_v31 = vpop.f32.mrf.mxu2  ;;  %v524_v32 = vpop.f32.mrf.mxu1 }
  0xc2   : >> { %v598_v33 = vpop.f32.mrf.mxu3  ;;  %v528_v34 = vadd.f32 %v524_v32, %v491_v18 }
  0xc3   : >> { %v635_v35 = vpop.f32.mrf.mxu0 }
  0xc4   : >> { %v565_v38 = vadd.f32 %v561_v31, %v528_v34  ;;  %2269 = vmatmul.msk.f32.gmra.mxu1 %vm163_vm1, %v1695_v14 }
  0xc6   : >> { %2291 = vmatmul.msk.f32.vlgmr.msrb.gmra.mxu2 %vm163_vm1, %v1885_v36  ;;  %2284 = vmatmul.msk.f32.gmra.mxu0 %vm163_vm1, %v1810_v17  ;;  %v602_v41 = vadd.f32 %v598_v33, %v565_v38 }
  0xc7   : >> { %2295 = vmatmul.msk.f32.vlgmr.msrb.gmra.mxu3 %vm163_vm1, %v1922_v37 }
  0xc8   : >> { %v639_v44 = vadd.f32 %v635_v35, %v602_v41 }
  0xc9   : >> { %v710_v45 = vpop.f32.mrf.mxu2  ;;  %v669_v46 = vpop.f32.mrf.mxu1 }
  0xca   : >> { %v747_v48 = vpop.f32.mrf.mxu3  ;;  %v675_v49 = vadd.f32 %v669_v46, %v638_v30 }
  0xcb   : >> { %v784_v50 = vpop.f32.mrf.mxu0 }
  0xcc   : >> { %v716_v52 = vadd.f32 %v710_v45, %v675_v49  ;;  %2287 = vmatmul.msk.f32.vlgmr.msra.gmra.mxu1 %vm163_vm1, %v1848_v47 }
  0xce   : >> { %2292 = vmatmul.msk.f32.gmra.mxu2 %vm163_vm1, %v1884_v27  ;;  %2299 = vmatmul.msk.f32.vlgmr.msra.gmra.mxu0 %vm163_vm1, %v1959_v51  ;;  %v753_v53 = vadd.f32 %v747_v48, %v716_v52 }
  0xcf   : >> { %2296 = vmatmul.msk.f32.gmra.mxu3 %vm163_vm1, %v1921_v29 }
  0xd0   : >> { %v790_v54 = vadd.f32 %v784_v50, %v753_v53 }
  0xd1   : >> { %v713_v55 = vpop.f32.mrf.mxu2  ;;  %v672_v56 = vpop.f32.mrf.mxu1 }
  0xd2   : >> { %v750_v57 = vpop.f32.mrf.mxu3  ;;  %v676_v58 = vadd.f32 %v672_v56, %v639_v44 }
  0xd3   : >> { %v787_v59 = vpop.f32.mrf.mxu0 }
  0xd4   : >> { %v717_v60 = vadd.f32 %v713_v55, %v676_v58  ;;  %2288 = vmatmul.msk.f32.gmra.mxu1 %vm163_vm1, %v1847_v40 }
  0xd6   : >> { %2300 = vmatmul.msk.f32.gmra.mxu0 %vm163_vm1, %v1958_v43  ;;  %v754_v61 = vadd.f32 %v750_v57, %v717_v60 }
  0xd8   : >> { %v791_v62 = vadd.f32 %v787_v59, %v754_v61 }
  0xd9   : >> { %v858_v63 = vpop.f32.mrf.mxu2  ;;  %v821_v0 = vpop.f32.mrf.mxu1 }
  0xda   : >> { %v895_v1 = vpop.f32.mrf.mxu3  ;;  %v827_v7 = vadd.f32 %v821_v0, %v790_v54 }
  0xdb   : >> { %v932_v2 = vpop.f32.mrf.mxu0 }
  0xdc   : >> { %v864_v14 = vadd.f32 %v858_v63, %v827_v7 }
  0xde   : >> { %v901_v15 = vadd.f32 %v895_v1, %v864_v14 }
  0xe0   : >> { %v938_v21 = vadd.f32 %v932_v2, %v901_v15 }
  0xe1   : >> { %v861_v3 = vpop.f32.mrf.mxu2  ;;  %v824_v4 = vpop.f32.mrf.mxu1 }
  0xe2   : >> { %v898_v5 = vpop.f32.mrf.mxu3  ;;  %v828_v16 = vadd.f32 %v824_v4, %v791_v62 }
  0xe3   : >> { %v935_v6 = vpop.f32.mrf.mxu0 }
  0xe4   : >> { %v865_v22 = vadd.f32 %v861_v3, %v828_v16 }
  0xe6   : >> { %v902_v24 = vadd.f32 %v898_v5, %v865_v22 }
  0xe8   : >> { %v939_v28 = vadd.f32 %v935_v6, %v902_v24 }
  0xe9   : >> { %v1010_v8 = vpop.f32.mrf.mxu2  ;;  %v973_v9 = vpop.f32.mrf.mxu1 }
  0xea   : >> { %v1047_v10 = vpop.f32.mrf.mxu3  ;;  %v979_v23 = vadd.f32 %v973_v9, %v938_v21 }
  0xeb   : >> { %v1084_v11 = vpop.f32.mrf.mxu0 }
  0xec   : >> { %v1016_v26 = vadd.f32 %v1010_v8, %v979_v23 }
  0xee   : >> { %v1053_v29 = vadd.f32 %v1047_v10, %v1016_v26 }
  0xf0   : >> { %v1090_v34 = vadd.f32 %v1084_v11, %v1053_v29 }
  0xf1   : >> { %v1013_v17 = vpop.f32.mrf.mxu2  ;;  %v976_v18 = vpop.f32.mrf.mxu1 }
  0xf2   : >> { %v1050_v19 = vpop.f32.mrf.mxu3  ;;  %v980_v30 = vadd.f32 %v976_v18, %v939_v28 }
  0xf3   : >> { %v1087_v20 = vpop.f32.mrf.mxu0 }
  0xf4   : >> { %v1017_v35 = vadd.f32 %v1013_v17, %v980_v30 }
  0xf6   : >> { %v1054_v38 = vadd.f32 %v1050_v19, %v1017_v35 }
  0xf8   : >> { %v1091_v43 = vadd.f32 %v1087_v20, %v1054_v38 }
  0xf9   : >> { %v1158_v25 = vpop.f32.mrf.mxu2  ;;  %v1121_v12 = vpop.f32.mrf.mxu1 }
  0xfa   : >> { %v1195_v13 = vpop.f32.mrf.mxu3  ;;  %v1127_v37 = vadd.f32 %v1121_v12, %v1090_v34 }
  0xfb   : >> { %v1236_v27 = vpop.f32.mrf.mxu0 }
  0xfc   : >> { %v1164_v39 = vadd.f32 %v1158_v25, %v1127_v37 }
  0xfe   : >> { %v1201_v45 = vadd.f32 %v1195_v13, %v1164_v39 }
 0x100   : >> { %v1242_v47 = vadd.f32 %v1236_v27, %v1201_v45 }
 0x101   : >> { %v1161_v31 = vpop.f32.mrf.mxu2  ;;  %v1124_v32 = vpop.f32.mrf.mxu1 }
 0x102   : >> { %v1198_v33 = vpop.f32.mrf.mxu3  ;;  %v1128_v46 = vadd.f32 %v1124_v32, %v1091_v43 }
 0x103   : >> { %v1239_v36 = vpop.f32.mrf.mxu0 }
 0x104   : >> { %v1165_v48 = vadd.f32 %v1161_v31, %v1128_v46 }
 0x106   : >> { %v1202_v54 = vadd.f32 %v1198_v33, %v1165_v48 }
 0x108   : >> { %v1243_v56 = vadd.f32 %v1239_v36, %v1202_v54 }
 0x109   : >> { %v1310_v40 = vpop.f32.mrf.mxu2  ;;  %v1273_v41 = vpop.f32.mrf.mxu1 }
 0x10a   : >> { %v1347_v42 = vpop.f32.mrf.mxu3  ;;  %v1279_v52 = vadd.f32 %v1273_v41, %v1242_v47 }
 0x10b   : >> { %v1384_v44 = vpop.f32.mrf.mxu0 }
 0x10c   : >> { %v1316_v55 = vadd.f32 %v1310_v40, %v1279_v52 }
 0x10e   : >> { %v1353_v60 = vadd.f32 %v1347_v42, %v1316_v55 }
 0x110   : >> { %v1390_v63 = vadd.f32 %v1384_v44, %v1353_v60 }
 0x111   : >> { %v1313_v49 = vpop.f32.mrf.mxu2  ;;  %v1276_v50 = vpop.f32.mrf.mxu1 }
 0x112   : >> { %v1350_v51 = vpop.f32.mrf.mxu3  ;;  %v1280_v61 = vadd.f32 %v1276_v50, %v1243_v56 }
 0x113   : >> { %v1387_v53 = vpop.f32.mrf.mxu0 }
 0x114   : >> { %v1317_v0 = vadd.f32 %v1313_v49, %v1280_v61 }
 0x116   : >> { %v1354_v5 = vadd.f32 %v1350_v51, %v1317_v0 }
 0x118   : >> { %v1391_v8 = vadd.f32 %v1387_v53, %v1354_v5 }
 0x119   : >> { %v1458_v57 = vpop.f32.mrf.mxu2  ;;  %v1421_v58 = vpop.f32.mrf.mxu1 }
 0x11a   : >> { %v1499_v59 = vpop.f32.mrf.mxu3  ;;  %v1427_v1 = vadd.f32 %v1421_v58, %v1390_v63 }
 0x11b   : >> { %v1536_v62 = vpop.f32.mrf.mxu0 }
 0x11c   : >> { %v1464_v7 = vadd.f32 %v1458_v57, %v1427_v1 }
 0x11e   : >> { %v1505_v9 = vadd.f32 %v1499_v59, %v1464_v7 }
 0x120   : >> { %v1542_v17 = vadd.f32 %v1536_v62, %v1505_v9 }
 0x121   : >> { %v1461_v2 = vpop.f32.mrf.mxu2  ;;  %v1424_v3 = vpop.f32.mrf.mxu1 }
 0x122   : >> { %v1502_v4 = vpop.f32.mrf.mxu3  ;;  %v1428_v10 = vadd.f32 %v1424_v3, %v1391_v8 }
 0x123   : >> { %v1539_v6 = vpop.f32.mrf.mxu0 }
 0x124   : >> { %v1465_v18 = vadd.f32 %v1461_v2, %v1428_v10 }
 0x126   : >> { %v1506_v20 = vadd.f32 %v1502_v4, %v1465_v18 }
 0x128   : >> { %v1543_v12 = vadd.f32 %v1539_v6, %v1506_v20 }
 0x129   : >> { %v1610_v11 = vpop.f32.mrf.mxu2  ;;  %v1573_v14 = vpop.f32.mrf.mxu1 }
 0x12a   : >> { %v1647_v15 = vpop.f32.mrf.mxu3  ;;  %v1579_v19 = vadd.f32 %v1573_v14, %v1542_v17 }
 0x12b   : >> { %v1684_v16 = vpop.f32.mrf.mxu0 }
 0x12c   : >> { %v1616_v24 = vadd.f32 %v1610_v11, %v1579_v19 }
 0x12e   : >> { %v1653_v13 = vadd.f32 %v1647_v15, %v1616_v24 }
 0x130   : >> { %v1690_v30 = vadd.f32 %v1684_v16, %v1653_v13 }
 0x131   : >> { %v1613_v21 = vpop.f32.mrf.mxu2  ;;  %v1576_v22 = vpop.f32.mrf.mxu1 }
 0x132   : >> { %v1650_v23 = vpop.f32.mrf.mxu3  ;;  %v1580_v26 = vadd.f32 %v1576_v22, %v1543_v12 }
 0x133   : >> { %v1687_v25 = vpop.f32.mrf.mxu0 }
 0x134   : >> { %v1617_v31 = vadd.f32 %v1613_v21, %v1580_v26 }
 0x136   : >> { %v1654_v34 = vadd.f32 %v1650_v23, %v1617_v31 }
 0x138   : >> { %v1691_v39 = vadd.f32 %v1687_v25, %v1654_v34 }
 0x139   : >> { %v1762_v27 = vpop.f32.mrf.mxu2  ;;  %v1721_v28 = vpop.f32.mrf.mxu1 }
 0x13a   : >> { %v1799_v29 = vpop.f32.mrf.mxu3  ;;  %v1727_v33 = vadd.f32 %v1721_v28, %v1690_v30 }
 0x13b   : >> { %v1836_v32 = vpop.f32.mrf.mxu0 }
 0x13c   : >> { %v1768_v35 = vadd.f32 %v1762_v27, %v1727_v33 }
 0x13e   : >> { %v1805_v41 = vadd.f32 %v1799_v29, %v1768_v35 }
 0x140   : >> { %v1842_v43 = vadd.f32 %v1836_v32, %v1805_v41 }
 0x141   : >> { %v1765_v36 = vpop.f32.mrf.mxu2  ;;  %v1724_v37 = vpop.f32.mrf.mxu1 }
 0x142   : >> { %v1802_v38 = vpop.f32.mrf.mxu3  ;;  %v1728_v42 = vadd.f32 %v1724_v37, %v1691_v39 }
 0x143   : >> { %v1839_v40 = vpop.f32.mrf.mxu0 }
 0x144   : >> { %v1769_v44 = vadd.f32 %v1765_v36, %v1728_v42 }
 0x146   : >> { %v1806_v50 = vadd.f32 %v1802_v38, %v1769_v44 }
 0x148   : >> { %v1843_v53 = vadd.f32 %v1839_v40, %v1806_v50 }
 0x149   : >> { %v1910_v45 = vpop.f32.mrf.mxu2  ;;  %v1873_v46 = vpop.f32.mrf.mxu1 }
 0x14a   : >> { %v1947_v47 = vpop.f32.mrf.mxu3  ;;  %v1879_v48 = vadd.f32 %v1873_v46, %v1842_v43 }
 0x14b   : >> { %v1984_v49 = vpop.f32.mrf.mxu0 }
 0x14c   : >> { %v1916_v51 = vadd.f32 %v1910_v45, %v1879_v48 }
 0x14e   : >> { %v1953_v52 = vadd.f32 %v1947_v47, %v1916_v51 }
 0x150   : >> { %v1990_v54 = vadd.f32 %v1984_v49, %v1953_v52 }
 0x151   : >> { %v1876_v55 = vpop.f32.mrf.mxu1  ;;  %v1913_v56 = vpop.f32.mrf.mxu2 }
 0x152   : >> { %1994 = vst.msk [vmem:[%s1992_s5] sm:$0xff] %vm1993_vm7, %v1990_v54  ;;  %v1880_v57 = vadd.f32 %v1876_v55, %v1843_v53  ;;  %v1950_v58 = vpop.f32.mrf.mxu3 }
 0x153   : >> { %v1987_v60 = vpop.f32.mrf.mxu0 }
 0x154   : >> { %v1917_v59 = vadd.f32 %v1913_v56, %v1880_v57 }
 0x156   : >> { %v1954_v61 = vadd.f32 %v1950_v58, %v1917_v59  ;;  %148 = sbr.rel (!%p146_p4) target bundleno = 15 (0xf), region = 121 }
 0x158   : >> { %v1991_v62 = vadd.f32 %v1987_v60, %v1954_v61 }
 0x15a   : >> { %1996 = vst.msk [vmem:[%s1992_s5 + $0x8] sm:$0x3] %vm1995_vm8, %v1991_v62 }
 0x15b PF: > { %s12_s9 = sadd.s32 1, %s2332_s9  }
 0x15c   : > { %p9_p5 = scmp.ge.s32.totalorder %s12_s9, 4  }
 0x15e   :  { %11 = sbr.rel (!%p9_p5) target bundleno = 1 (0x1), region = 132 }

</bundles_post_ra>
